<compile_context>
chip_gen: v7x
topology: tpu7x:2x2x1
jax: 0.10.0
libtpu: 0.0.40
codegen_flags: <defaults>
</compile_context>

<pallas_src>
import jax
import jax.numpy as jnp
from jax.experimental import pallas as pl
from jax.experimental.pallas import tpu as pltpu

IN_DIM = 1220
H_DIM = 150
OUT_DIM = 1

# Zero padding of weight columns/rows is exact through matmul + bias + ReLU.
H_PAD = 256      # hidden 150 -> 2*128
OUT_PAD = 8      # last-layer output columns (wrapper slices column 0)
_LANE_IN = 1280  # 1220 lanes round up to 10*128 inside VMEM (layout estimate only)


def ffnn_kernel(x_ref, w0_ref, b0_ref, w1_ref, b1_ref, w2_ref, b2_ref, o_ref):
    cdt = w0_ref.dtype                      # compute dtype (bf16 or f32)
    x = x_ref[...].astype(cdt)              # cast in-kernel: no extra HBM pass
    # layer0: (bm, 1220) @ (1220, 256) + b0 -> ReLU   (f32 accumulation)
    h0 = jnp.dot(x, w0_ref[...], preferred_element_type=jnp.float32)
    h0 = jnp.maximum(h0 + b0_ref[...], 0.0)
    # layer1: (bm, 256) @ (256, 256) + b1 -> ReLU
    h1 = jnp.dot(h0.astype(cdt), w1_ref[...], preferred_element_type=jnp.float32)
    h1 = jnp.maximum(h1 + b1_ref[...], 0.0)
    # layer2: (bm, 256) @ (256, 8) + b2 -> ReLU.  Plain matmul, no transpose;
    # only column 0 is real (w2 zero-padded), the wrapper slices it out.
    s = jnp.dot(h1.astype(cdt), w2_ref[...], preferred_element_type=jnp.float32)
    s = jnp.maximum(s + b2_ref[0, 0], 0.0)  # b2 scalar read from SMEM
    o_ref[...] = s.astype(o_ref.dtype)


def prepare_params(params, compute_dtype=jnp.bfloat16):
    """One-time preprocessing (hoist out of the per-call forward path).

    PyTorch layout (out, in) -> transposed (in, out), zero-padded to
    MXU/lane-friendly sizes, cast to the compute dtype. Biases stay f32.
    """
    w0p = jnp.pad(params["w0"].T, ((0, 0), (0, H_PAD - H_DIM))).astype(compute_dtype)
    b0p = jnp.pad(params["b0"], (0, H_PAD - H_DIM)).reshape(1, H_PAD).astype(jnp.float32)
    w1p = jnp.pad(params["w1"].T,
                  ((0, H_PAD - H_DIM), (0, H_PAD - H_DIM))).astype(compute_dtype)
    b1p = jnp.pad(params["b1"], (0, H_PAD - H_DIM)).reshape(1, H_PAD).astype(jnp.float32)
    w2p = jnp.pad(params["w2"].T,
                  ((0, H_PAD - H_DIM), (0, OUT_PAD - OUT_DIM))).astype(compute_dtype)
    b2p = params["b2"].reshape(1, 1).astype(jnp.float32)
    return {"w0": w0p, "b0": b0p, "w1": w1p, "b1": b1p, "w2": w2p, "b2": b2p}


def _approx_vmem_bytes(bm, x_itemsize, w_itemsize):
    x_tiles = 2 * bm * _LANE_IN * x_itemsize                     # double-buffered x stream
    weights = 2 * ((_LANE_IN * H_PAD + H_PAD * H_PAD + H_PAD * 128) * w_itemsize
                   + 2 * H_PAD * 4)                              # resident weights + biases
    inter = 5 * bm * H_PAD * 4                                   # h0/h1 f32 + casted copies
    out_tiles = 2 * bm * 128 * 4                                 # (bm, 8) lane-padded
    return x_tiles + weights + inter + out_tiles


def _round_up(v, m):
    return ((int(v) + m - 1) // m) * m


def ffnn_mention_forward(x, prep, *, bm=1024):
    """x: (B, 1220), any float dtype (bf16 input halves the HBM stream).
    prep: output of prepare_params(). Returns (B, 1) float32 scores."""
    B, F = x.shape
    assert F == IN_DIM, f"expected {IN_DIM} input features, got {F}"
    w0p, b0p, w1p, b1p, w2p, b2p = (prep[k] for k in ("w0", "b0", "w1", "b1", "w2", "b2"))

    # --- batch tile selection -------------------------------------------------
    bm = max(128, _round_up(bm, 128))
    bm = min(bm, _round_up(B, 128))                 # never larger than the batch
    if B > 128 and pl.cdiv(B, bm) < 2:
        # >= 2 grid steps so the 'parallel' axis maps onto both v7x TensorCores.
        bm = max(128, _round_up(pl.cdiv(B, 2), 128))

    # --- VMEM budget (query HW when possible; never hard-fail, shrink bm) ------
    try:
        cap = int(0.85 * pltpu.get_tpu_info().vmem_capacity_bytes)
    except Exception:
        cap = 56 * 1024 * 1024                      # safe for v7x's 64 MiB VMEM
    cap = max(cap, 32 * 1024 * 1024)
    x_isz = jnp.dtype(x.dtype).itemsize
    w_isz = jnp.dtype(w0p.dtype).itemsize
    while bm > 128 and _approx_vmem_bytes(bm, x_isz, w_isz) > cap:
        bm -= 128
    approx = _approx_vmem_bytes(bm, x_isz, w_isz)
    vmem_limit = int(min(cap, max(32 * 1024 * 1024, 1.5 * approx)))

    nblocks = pl.cdiv(B, bm)

    flops = 2 * B * (IN_DIM * H_PAD + H_PAD * H_PAD + H_PAD * OUT_PAD)
    weight_bytes = ((IN_DIM * H_PAD + H_PAD * H_PAD + H_PAD * OUT_PAD) * w_isz
                    + 2 * H_PAD * 4 + 4)
    bytes_accessed = B * IN_DIM * x_isz + weight_bytes + B * OUT_PAD * 4

    out = pl.pallas_call(
        ffnn_kernel,
        out_shape=jax.ShapeDtypeStruct((B, OUT_PAD), jnp.float32),
        grid_spec=pltpu.PrefetchScalarGridSpec(
            num_scalar_prefetch=0,
            grid=(nblocks,),
            in_specs=[
                pl.BlockSpec((bm, IN_DIM), lambda i: (i, 0)),        # x tile (streamed)
                pl.BlockSpec((IN_DIM, H_PAD), lambda i: (0, 0)),     # w0 (resident)
                pl.BlockSpec((1, H_PAD), lambda i: (0, 0)),          # b0
                pl.BlockSpec((H_PAD, H_PAD), lambda i: (0, 0)),      # w1 (resident)
                pl.BlockSpec((1, H_PAD), lambda i: (0, 0)),          # b1
                pl.BlockSpec((H_PAD, OUT_PAD), lambda i: (0, 0)),    # w2^T (resident)
                pl.BlockSpec(memory_space=pltpu.MemorySpace.SMEM),   # b2 scalar
            ],
            out_specs=pl.BlockSpec((bm, OUT_PAD), lambda i: (i, 0)),
        ),
        compiler_params=pltpu.CompilerParams(
            dimension_semantics=("parallel",),       # batch axis -> megacore
            vmem_limit_bytes=vmem_limit),
        cost_estimate=pl.CostEstimate(
            flops=flops, transcendentals=0, bytes_accessed=bytes_accessed),
    )(x, w0p, b0p, w1p, b1p, w2p, b2p)

    # Column 0 holds the real score; padded columns 1..7 are discarded.
    return out[:, :OUT_DIM]


def init_params(key):
    """Deterministic init mirroring nn.Linear parameter shapes (out, in)."""
    k0, k1, k2, k3, k4, k5 = jax.random.split(key, 6)

    def uniform_linear(kw, kb, fan_in, fan_out):
        bound = 1.0 / jnp.sqrt(fan_in)
        w = jax.random.uniform(kw, (fan_out, fan_in), jnp.float32, -bound, bound)
        b = jax.random.uniform(kb, (fan_out,), jnp.float32, -bound, bound)
        return w, b

    w0, b0 = uniform_linear(k0, k1, IN_DIM, H_DIM)
    w1, b1 = uniform_linear(k2, k3, H_DIM, H_DIM)
    w2, b2 = uniform_linear(k4, k5, H_DIM, OUT_DIM)
    return {"w0": w0, "b0": b0, "w1": w1, "b1": b1, "w2": w2, "b2": b2}


def ffnn_mention_ref(x, p):
    """Pure-JAX reference (PyTorch eval-mode semantics, incl. final ReLU)."""
    h = jnp.maximum(x @ p["w0"].T + p["b0"], 0.0)
    h = jnp.maximum(h @ p["w1"].T + p["b1"], 0.0)
    h = jnp.maximum(h @ p["w2"].T + p["b2"], 0.0)
    return h


if __name__ == "__main__":
    key = jax.random.PRNGKey(0)
    k_params, k_x1, k_x2 = jax.random.split(key, 3)
    params = init_params(k_params)

    # One-time parameter preprocessing (hoisted out of the forward path).
    prep_f32 = prepare_params(params, compute_dtype=jnp.float32)
    prep_bf16 = prepare_params(params, compute_dtype=jnp.bfloat16)   # default path

    # 1) Small ragged batch, f32 compute: tight tolerance; exercises a partial
    #    edge block (garbage rows are row-local and never written back).
    x1 = jax.random.normal(k_x1, (33, IN_DIM), jnp.float32)
    out1 = jax.block_until_ready(ffnn_mention_forward(x1, prep_f32))
    ref1 = ffnn_mention_ref(x1, params)
    assert out1.shape == (33, OUT_DIM), out1.shape
    assert jnp.allclose(out1, ref1, atol=5e-4, rtol=5e-4), (
        float(jnp.max(jnp.abs(out1 - ref1))))

    # 2) Multi-tile batch, default bf16 operands (f32 accumulation), bf16 x
    #    stream: exercises >= 2 grid steps ('parallel' axis) and edge handling.
    x2 = jax.random.normal(k_x2, (512, IN_DIM), jnp.float32)
    out2 = jax.block_until_ready(
        ffnn_mention_forward(x2.astype(jnp.bfloat16), prep_bf16, bm=1024))
    ref2 = ffnn_mention_ref(x2, params)
    assert out2.shape == (512, OUT_DIM), out2.shape
    assert jnp.allclose(out2, ref2, atol=3e-2, rtol=3e-2), (
        float(jnp.max(jnp.abs(out2 - ref2))))

    print("KERNEL_OK")
</pallas_src>

<mosaic_0001>
module attributes {stable_mosaic.version = 11 : i64} {
  func.func @ffnn_kernel(%arg0: i32, %arg1: memref<128x1220xf32, #tpu.memory_space<vmem>>, %arg2: memref<1220x256xf32, #tpu.memory_space<vmem>>, %arg3: memref<1x256xf32, #tpu.memory_space<vmem>>, %arg4: memref<256x256xf32, #tpu.memory_space<vmem>>, %arg5: memref<1x256xf32, #tpu.memory_space<vmem>>, %arg6: memref<256x8xf32, #tpu.memory_space<vmem>>, %arg7: memref<1x1xf32, #tpu.memory_space<smem>>, %arg8: memref<128x8xf32, #tpu.memory_space<vmem>>) attributes {dimension_semantics = [#tpu.dimension_semantics<parallel>], iteration_bounds = array<i64: 1>, scalar_prefetch = 0 : i64, scratch_operands = 0 : i64, tpu.core_type = #tpu.core_type<tc>, window_params = [{transform_indices = @transform_0, window_bounds = array<i64: 128, 1220>}, {pipeline_mode = #tpu.pipeline_mode<synchronous>, transform_indices = @transform_1, window_bounds = array<i64: 1220, 256>}, {pipeline_mode = #tpu.pipeline_mode<synchronous>, transform_indices = @transform_2, window_bounds = array<i64: 1, 256>}, {pipeline_mode = #tpu.pipeline_mode<synchronous>, transform_indices = @transform_3, window_bounds = array<i64: 256, 256>}, {pipeline_mode = #tpu.pipeline_mode<synchronous>, transform_indices = @transform_4, window_bounds = array<i64: 1, 256>}, {pipeline_mode = #tpu.pipeline_mode<synchronous>, transform_indices = @transform_5, window_bounds = array<i64: 256, 8>}, {transform_indices = @transform_6, window_bounds = array<i64: 1, 1>}, {transform_indices = @transform_7, window_bounds = array<i64: 128, 8>}]} {
    %c0 = arith.constant 0 : index
    %c0_0 = arith.constant 0 : index
    %0 = vector.load %arg1[%c0, %c0_0] : memref<128x1220xf32, #tpu.memory_space<vmem>>, vector<128x1220xf32>
    %c0_1 = arith.constant 0 : index
    %c0_2 = arith.constant 0 : index
    %1 = vector.load %arg2[%c0_1, %c0_2] : memref<1220x256xf32, #tpu.memory_space<vmem>>, vector<1220x256xf32>
    %cst = arith.constant dense<0.000000e+00> : vector<128x256xf32>
    %2 = tpu.matmul %0, %1, %cst {dimension_numbers = #tpu.dot_dimension_numbers<[1], [0], [0], [1], [0, 0, 1, 1], [], []>} : vector<128x1220xf32>, vector<1220x256xf32>, vector<128x256xf32> -> vector<128x256xf32>
    %c0_3 = arith.constant 0 : index
    %c0_4 = arith.constant 0 : index
    %3 = vector.load %arg3[%c0_3, %c0_4] : memref<1x256xf32, #tpu.memory_space<vmem>>, vector<1x256xf32>
    %4 = vector.broadcast %3 : vector<1x256xf32> to vector<128x256xf32>
    %5 = arith.addf %2, %4 : vector<128x256xf32>
    %cst_5 = arith.constant 0.000000e+00 : f32
    %6 = vector.broadcast %cst_5 : f32 to vector<128x256xf32>
    %7 = arith.maximumf %5, %6 : vector<128x256xf32>
    %c0_6 = arith.constant 0 : index
    %c0_7 = arith.constant 0 : index
    %8 = vector.load %arg4[%c0_6, %c0_7] : memref<256x256xf32, #tpu.memory_space<vmem>>, vector<256x256xf32>
    %cst_8 = arith.constant dense<0.000000e+00> : vector<128x256xf32>
    %9 = tpu.matmul %7, %8, %cst_8 {dimension_numbers = #tpu.dot_dimension_numbers<[1], [0], [0], [1], [0, 0, 1, 1], [], []>} : vector<128x256xf32>, vector<256x256xf32>, vector<128x256xf32> -> vector<128x256xf32>
    %c0_9 = arith.constant 0 : index
    %c0_10 = arith.constant 0 : index
    %10 = vector.load %arg5[%c0_9, %c0_10] : memref<1x256xf32, #tpu.memory_space<vmem>>, vector<1x256xf32>
    %11 = vector.broadcast %10 : vector<1x256xf32> to vector<128x256xf32>
    %12 = arith.addf %9, %11 : vector<128x256xf32>
    %cst_11 = arith.constant 0.000000e+00 : f32
    %13 = vector.broadcast %cst_11 : f32 to vector<128x256xf32>
    %14 = arith.maximumf %12, %13 : vector<128x256xf32>
    %c0_12 = arith.constant 0 : index
    %c0_13 = arith.constant 0 : index
    %15 = vector.load %arg6[%c0_12, %c0_13] : memref<256x8xf32, #tpu.memory_space<vmem>>, vector<256x8xf32>
    %cst_14 = arith.constant dense<0.000000e+00> : vector<128x8xf32>
    %16 = tpu.matmul %14, %15, %cst_14 {dimension_numbers = #tpu.dot_dimension_numbers<[1], [0], [0], [1], [0, 0, 1, 1], [], []>} : vector<128x256xf32>, vector<256x8xf32>, vector<128x8xf32> -> vector<128x8xf32>
    %c0_15 = arith.constant 0 : index
    %c0_16 = arith.constant 0 : index
    %17 = memref.load %arg7[%c0_15, %c0_16] : memref<1x1xf32, #tpu.memory_space<smem>>
    %18 = vector.broadcast %17 : f32 to vector<128x8xf32>
    %19 = arith.addf %16, %18 : vector<128x8xf32>
    %cst_17 = arith.constant 0.000000e+00 : f32
    %20 = vector.broadcast %cst_17 : f32 to vector<128x8xf32>
    %21 = arith.maximumf %19, %20 : vector<128x8xf32>
    %c0_18 = arith.constant 0 : index
    %c0_19 = arith.constant 0 : index
    %22 = vector.load %arg8[%c0_18, %c0_19] : memref<128x8xf32, #tpu.memory_space<vmem>>, vector<128x8xf32>
    tpu.vector_store %arg8[%c0_18, %c0_19], %21 {strides = array<i32>} : memref<128x8xf32, #tpu.memory_space<vmem>>, vector<128x8xf32>,
    return
  }
  func.func @transform_0(%arg0: i32) -> (i32, i32) {
    %c0_i32 = arith.constant 0 : i32
    %c0_i32_0 = arith.constant 0 : i32
    return %arg0, %c0_i32 : i32, i32
  }
  func.func @transform_1(%arg0: i32) -> (i32, i32) {
    %c0_i32 = arith.constant 0 : i32
    %c0_i32_0 = arith.constant 0 : i32
    %c0_i32_1 = arith.constant 0 : i32
    return %c0_i32, %c0_i32_0 : i32, i32
  }
  func.func @transform_2(%arg0: i32) -> (i32, i32) {
    %c0_i32 = arith.constant 0 : i32
    %c0_i32_0 = arith.constant 0 : i32
    %c0_i32_1 = arith.constant 0 : i32
    return %c0_i32, %c0_i32_0 : i32, i32
  }
  func.func @transform_3(%arg0: i32) -> (i32, i32) {
    %c0_i32 = arith.constant 0 : i32
    %c0_i32_0 = arith.constant 0 : i32
    %c0_i32_1 = arith.constant 0 : i32
    return %c0_i32, %c0_i32_0 : i32, i32
  }
  func.func @transform_4(%arg0: i32) -> (i32, i32) {
    %c0_i32 = arith.constant 0 : i32
    %c0_i32_0 = arith.constant 0 : i32
    %c0_i32_1 = arith.constant 0 : i32
    return %c0_i32, %c0_i32_0 : i32, i32
  }
  func.func @transform_5(%arg0: i32) -> (i32, i32) {
    %c0_i32 = arith.constant 0 : i32
    %c0_i32_0 = arith.constant 0 : i32
    %c0_i32_1 = arith.constant 0 : i32
    return %c0_i32, %c0_i32_0 : i32, i32
  }
  func.func @transform_6(%arg0: i32) -> (i32, i32) {
    %c0_i32 = arith.constant 0 : i32
    %c0_i32_0 = arith.constant 0 : i32
    %c0_i32_1 = arith.constant 0 : i32
    return %c0_i32, %c0_i32_0 : i32, i32
  }
  func.func @transform_7(%arg0: i32) -> (i32, i32) {
    %c0_i32 = arith.constant 0 : i32
    %c0_i32_0 = arith.constant 0 : i32
    return %arg0, %c0_i32 : i32, i32
  }
}

</mosaic_0001>

<bundles_post_ra>
// kernel: tpu_custom_call.1
= control target key start
LH: loop header
LB: loop body
LE: loop exit
PB: predicated region body
PF: predicated region fallthrough
CT: control target
= control target key end

     0   :  { %13 = vsyncpa [#allocation4], 0  ;;  %s3193_s0 = inlined_call_operand.hbm [shape: f32[33,1220], index: 0, kind: input, shape index: {}]   ;;  %s3194_s1 = inlined_call_operand.hbm [shape: f32[1220,256], index: 1, kind: input, shape index: {}]   ;;  %s3195_s2 = inlined_call_operand.hbm [shape: f32[1,256], index: 2, kind: input, shape index: {}]   ;;  %s3196_s3 = inlined_call_operand.hbm [shape: f32[256,256], index: 3, kind: input, shape index: {}]   ;;  %s3197_s4 = inlined_call_operand.hbm [shape: f32[1,256], index: 4, kind: input, shape index: {}]   ;;  %s3198_s5 = inlined_call_operand.vmem [shape: f32[256,8], index: 5, kind: input, shape index: {}]   ;;  %s3199_s6 = inlined_call_operand.<no memory space> [shape: f32[1,1], index: 6, kind: input, shape index: {}]   ;;  %s3200_s7 = inlined_call_operand.vmem [shape: f32[33,8], index: 7, kind: output, shape index: {}]  }
   0x1   :  { %14 = vsyncpa [#allocation6], 0 }
   0x2   :  { %15 = vsyncpa [#allocation9], 0 }
   0x3   :  { %20 = vsyncadd [#allocation4], 14080  ;;  %s2785_s24 = smov [#allocation5]   ;;  %s2669_s28 = scalar_lea.hbm %s3194_s1, 39168 }
   0x4   :  { %s33_s25 = sshll.u32 %s2785_s24, 4  ;;  %p2670_p0 = scmp.ne.s32.totalorder %s3194_s1, %s2669_s28  ;;  %s34_s25 = int_to_ptr.vmem [resolvable:$true] %s33_s25 }
   0x5   :  { %p2673_p1 = scmp.lt.u32.totalorder %s2669_s28, %s3194_s1 }
   0x7   :  { %p2675_p2 = pnand %p2673_p1, %p2670_p0 }
   0x9   :  { %2678 = shalt.err (!%p2675_p2)
}
   0xa   :  { %s2679_s10 = scalar_lea.vmem %s34_s25, 39168  ;;  %p2684_p4 = scmp.lt.s32.totalorder %s34_s25, %s34_s25 }
   0xb   :  { %p2680_p3 = scmp.ne.s32.totalorder %s34_s25, %s2679_s10  ;;  %p2685_p5 = scmp.lt.s32.totalorder %s2679_s10, %s2679_s10 }
   0xd   :  { %p2686_p6 = por %p2685_p5, %p2684_p4 }
   0xf   :  { %p2687_p7 = pnand %p2686_p6, %p2680_p3 }
  0x11   :  { %2690 = shalt.err (!%p2687_p7)
}
  0x12   :  { %s2786_s11 = smov 256   ;;  %s2787_s12 = smov 16  }
  0x13   :  { %39 = dma.hbm_to_vmem [thread:$0]  %s3194_s1, 39168, %s34_s25, [#allocation6], %s2786_s11, %s2786_s11, %s2787_s12  }
  0x14   :  { %s2788_s15 = smov [#allocation8]   ;;  %s2789_s17 = smov [#allocation3]  }
  0x15   :  { %s55_s16 = sshll.u32 %s2788_s15, 4  ;;  %s21_s18 = sshll.u32 %s2789_s17, 4  ;;  %s56_s16 = int_to_ptr.vmem [resolvable:$true] %s55_s16  ;;  %s22_s18 = int_to_ptr.vmem [resolvable:$true] %s21_s18 }
  0x16   :  { %s2691_s21 = scalar_lea.hbm %s3196_s3, 8192 }
  0x17   :  { %p2692_p8 = scmp.ne.s32.totalorder %s3196_s3, %s2691_s21  ;;  %p2695_p9 = scmp.lt.u32.totalorder %s2691_s21, %s3196_s3 }
  0x19   :  { %p2697_p10 = pnand %p2695_p9, %p2692_p8 }
  0x1b   :  { %2700 = shalt.err (!%p2697_p10)
}
  0x1c   :  { %s2701_s1 = scalar_lea.vmem %s56_s16, 8192  ;;  %p2706_p12 = scmp.lt.s32.totalorder %s56_s16, %s56_s16 }
  0x1d   :  { %p2702_p11 = scmp.ne.s32.totalorder %s56_s16, %s2701_s1  ;;  %p2707_p13 = scmp.lt.s32.totalorder %s2701_s1, %s2701_s1 }
  0x1f   :  { %p2708_p0 = por %p2707_p13, %p2706_p12 }
  0x21   :  { %p2709_p1 = pnand %p2708_p0, %p2702_p11 }
  0x23   :  { %2712 = shalt.err (!%p2709_p1)
}
  0x24   :  { %61 = dma.hbm_to_vmem [thread:$0]  %s3196_s3, 8192, %s56_s16, [#allocation9], %s2786_s11, %s2786_s11, %s2787_s12  }
  0x25   :  { %s2713_s30 = scalar_lea.hbm %s3193_s0, 6400 }
  0x26   :  { %p2714_p2 = scmp.ne.s32.totalorder %s3193_s0, %s2713_s30  ;;  %p2717_p3 = scmp.lt.u32.totalorder %s2713_s30, %s3193_s0 }
  0x28   :  { %p2719_p4 = pnand %p2717_p3, %p2714_p2 }
  0x2a   :  { %2722 = shalt.err (!%p2719_p4)
}
  0x2b   :  { %s2723_s14 = scalar_lea.vmem %s22_s18, 6400  ;;  %s2727_s15 = scalar_lea.vmem %s22_s18, 20480 }
  0x2c   :  { %p2724_p5 = scmp.ne.s32.totalorder %s22_s18, %s2723_s14  ;;  %p2728_p6 = scmp.lt.s32.totalorder %s22_s18, %s22_s18 }
  0x2d   :  { %p2729_p7 = scmp.lt.s32.totalorder %s2727_s15, %s2723_s14 }
  0x2f   :  { %p2730_p8 = por %p2729_p7, %p2728_p6 }
  0x31   :  { %p2731_p9 = pnand %p2730_p8, %p2724_p5 }
  0x33   :  { %2734 = shalt.err (!%p2731_p9)
}
  0x34   :  { %s2790_s3 = smov 1280   ;;  %s2791_s11 = smov 80  }
  0x35   :  { %27 = dma.hbm_to_vmem [thread:$0]  %s3193_s0, 6400, %s22_s18, [#allocation4], %s2790_s3, %s2790_s3, %s2791_s11  }
  0x36   :  { %s2792_s17 = smov [#allocation7]   ;;  %s2793_s20 = smov [#allocation10]  }
  0x37   :  { %s46_s19 = sshll.u32 %s2792_s17, 4  ;;  %s68_s21 = sshll.u32 %s2793_s20, 4  ;;  %s47_s19 = int_to_ptr.vmem [resolvable:$true] %s46_s19  ;;  %s69_s21 = int_to_ptr.vmem [resolvable:$true] %s68_s21 }
  0x38   :  { %s2735_s24 = scalar_lea.hbm %s3195_s2, 32 }
  0x39   :  { %p2736_p10 = scmp.ne.s32.totalorder %s3195_s2, %s2735_s24  ;;  %p2739_p11 = scmp.lt.u32.totalorder %s2735_s24, %s3195_s2 }
  0x3b   :  { %p2741_p12 = pnand %p2739_p11, %p2736_p10 }
  0x3d   :  { %2744 = shalt.err (!%p2741_p12)
}
  0x3e   :  { %s2745_s0 = scalar_lea.vmem %s47_s19, 32  ;;  %p2750_p0 = scmp.lt.s32.totalorder %s47_s19, %s47_s19 }
  0x3f   :  { %p2746_p13 = scmp.ne.s32.totalorder %s47_s19, %s2745_s0  ;;  %p2751_p1 = scmp.lt.s32.totalorder %s2745_s0, %s2745_s0 }
  0x41   :  { %p2752_p2 = por %p2751_p1, %p2750_p0 }
  0x43   :  { %p2753_p3 = pnand %p2752_p2, %p2746_p13 }
  0x45   :  { %2756 = shalt.err (!%p2753_p3)
}
  0x46   :  { %49 = dma.hbm_to_vmem [thread:$0]  %s3195_s2, 32, %s47_s19, [#allocation6]  }
  0x47   :  { %s2757_s8 = scalar_lea.hbm %s3197_s4, 32 }
  0x48   :  { %p2758_p4 = scmp.ne.s32.totalorder %s3197_s4, %s2757_s8  ;;  %p2761_p5 = scmp.lt.u32.totalorder %s2757_s8, %s3197_s4 }
  0x4a   :  { %p2763_p6 = pnand %p2761_p5, %p2758_p4 }
  0x4c   :  { %2766 = shalt.err (!%p2763_p6)
}
  0x4d   :  { %s2767_s15 = scalar_lea.vmem %s69_s21, 32  ;;  %p2772_p8 = scmp.lt.s32.totalorder %s69_s21, %s69_s21 }
  0x4e   :  { %p2768_p7 = scmp.ne.s32.totalorder %s69_s21, %s2767_s15  ;;  %p2773_p9 = scmp.lt.s32.totalorder %s2767_s15, %s2767_s15 }
  0x50   :  { %p2774_p10 = por %p2773_p9, %p2772_p8 }
  0x52   :  { %p2775_p11 = pnand %p2774_p10, %p2768_p7 }
  0x54   :  { %2778 = shalt.err (!%p2775_p11)
}
  0x55   :  { %71 = dma.hbm_to_vmem [thread:$0]  %s3197_s4, 32, %s69_s21, [#allocation9]  }
  0x56   :  { %2779 = dma.done.wait [#allocation4], 20480  }
  0x57   :  { %2780 = vsyncadd [#allocation4], 4294946816 }
  0x58   :  { %2781 = dma.done.wait [#allocation6], 39200  }
  0x59   :  { %2782 = vsyncadd [#allocation6], 4294928096 }
  0x5a   :  { %2783 = dma.done.wait [#allocation9], 8224  }
  0x5b   :  { %2784 = vsyncadd [#allocation9], 4294959072  ;;  %v316_v0 = vld [vmem:[#allocation5 + $0x208] sm:$0xff]  ;;  %v318_v1 = vld [vmem:[#allocation5 + $0x218] sm:$0xff]  ;;  %vm618_vm0 = vcmask 1043456   ;;  %vm569_vm1 = vcmask 556032  }
  0x5c   :  { %v315_v2 = vld [vmem:[#allocation5 + $0x200] sm:$0xff]  ;;  %v2164_v3 = vpack.c.bf16 %v318_v1, %v316_v0  ;;  %v317_v4 = vld [vmem:[#allocation5 + $0x210] sm:$0xff]  ;;  %v320_v5 = vld [vmem:[#allocation5 + $0x228] sm:$0xff]  ;;  %vm1926_vm2 = vcmask 64512  }
  0x5d   :  { %v322_v6 = vld [vmem:[#allocation5 + $0x238] sm:$0xff]  ;;  %v2166_v7 = vpack.c.bf16 %v317_v4, %v315_v2  ;;  %v319_v9 = vld [vmem:[#allocation5 + $0x220] sm:$0xff]  ;;  %v321_v10 = vld [vmem:[#allocation5 + $0x230] sm:$0xff] }
  0x5e   :  { %v2168_v8 = vpack.c.bf16 %v322_v6, %v320_v5  ;;  %v324_v11 = vld [vmem:[#allocation5 + $0x248] sm:$0xff]  ;;  %2165 = vmatprep.subr.bf16.mxu0 %v2164_v3  ;;  %v326_v12 = vld [vmem:[#allocation5 + $0x258] sm:$0xff]  ;;  %v2170_v13 = vpack.c.bf16 %v321_v10, %v319_v9  ;;  %v323_v15 = vld [vmem:[#allocation5 + $0x240] sm:$0xff] }
  0x5f   :  { %2167 = vmatpush1.bf16.msra.mxu0 %v2166_v7  ;;  %v2172_v14 = vpack.c.bf16 %v326_v12, %v324_v11  ;;  %v325_v16 = vld [vmem:[#allocation5 + $0x250] sm:$0xff]  ;;  %v328_v17 = vld [vmem:[#allocation5 + $0x268] sm:$0xff]  ;;  %v330_v18 = vld [vmem:[#allocation5 + $0x278] sm:$0xff] }
  0x60   :  { %2169 = vmatprep.subr.bf16.mxu0 %v2168_v8  ;;  %v2174_v19 = vpack.c.bf16 %v325_v16, %v323_v15  ;;  %v2176_v20 = vpack.c.bf16 %v330_v18, %v328_v17  ;;  %v327_v21 = vld [vmem:[#allocation5 + $0x260] sm:$0xff]  ;;  %v329_v22 = vld [vmem:[#allocation5 + $0x270] sm:$0xff]  ;;  %v332_v23 = vld [vmem:[#allocation5 + $0x288] sm:$0xff] }
  0x61   :  { %v334_v24 = vld [vmem:[#allocation5 + $0x298] sm:$0xff]  ;;  %v2178_v25 = vpack.c.bf16 %v329_v22, %v327_v21  ;;  %v331_v27 = vld [vmem:[#allocation5 + $0x280] sm:$0xff]  ;;  %v333_v28 = vld [vmem:[#allocation5 + $0x290] sm:$0xff] }
  0x62   :  { %v2180_v26 = vpack.c.bf16 %v334_v24, %v332_v23  ;;  %v336_v29 = vld [vmem:[#allocation5 + $0x2a8] sm:$0xff]  ;;  %v338_v30 = vld [vmem:[#allocation5 + $0x2b8] sm:$0xff]  ;;  %v2182_v31 = vpack.c.bf16 %v333_v28, %v331_v27  ;;  %v335_v33 = vld [vmem:[#allocation5 + $0x2a0] sm:$0xff] }
  0x63   :  { %2171 = vmatpush1.bf16.msra.mxu0 %v2170_v13  ;;  %v2184_v32 = vpack.c.bf16 %v338_v30, %v336_v29  ;;  %v337_v34 = vld [vmem:[#allocation5 + $0x2b0] sm:$0xff]  ;;  %v340_v35 = vld [vmem:[#allocation5 + $0x2c8] sm:$0xff]  ;;  %v342_v36 = vld [vmem:[#allocation5 + $0x2d8] sm:$0xff] }
  0x64   :  { %2173 = vmatprep.subr.bf16.mxu0 %v2172_v14  ;;  %v2186_v37 = vpack.c.bf16 %v337_v34, %v335_v33  ;;  %v2188_v38 = vpack.c.bf16 %v342_v36, %v340_v35  ;;  %v339_v39 = vld [vmem:[#allocation5 + $0x2c0] sm:$0xff]  ;;  %v341_v40 = vld [vmem:[#allocation5 + $0x2d0] sm:$0xff]  ;;  %v94_v41 = vld [vmem:[#allocation3 + $0x18] sm:$0xff] }
  0x65   :  { %v344_v42 = vld [vmem:[#allocation5 + $0x2e8] sm:$0xff]  ;;  %v346_v43 = vld [vmem:[#allocation5 + $0x2f8] sm:$0xff]  ;;  %850 = vmatprep.mubr.f32.mxu0 %v94_v41  ;;  %v2190_v44 = vpack.c.bf16 %v341_v40, %v339_v39  ;;  %v343_v46 = vld [vmem:[#allocation5 + $0x2e0] sm:$0xff] }
  0x66   :  { %v2192_v45 = vpack.c.bf16 %v346_v43, %v344_v42  ;;  %v345_v47 = vld [vmem:[#allocation5 + $0x2f0] sm:$0xff]  ;;  %v348_v48 = vld [vmem:[#allocation5 + $0x308] sm:$0xff]  ;;  %v350_v49 = vld [vmem:[#allocation5 + $0x318] sm:$0xff] }
  0x67   :  { %2175 = vmatpush1.bf16.msra.mxu0 %v2174_v19  ;;  %v2194_v50 = vpack.c.bf16 %v345_v47, %v343_v46  ;;  %v2196_v51 = vpack.c.bf16 %v350_v49, %v348_v48  ;;  %v347_v52 = vld [vmem:[#allocation5 + $0x300] sm:$0xff]  ;;  %v349_v53 = vld [vmem:[#allocation5 + $0x310] sm:$0xff]  ;;  %v352_v54 = vld [vmem:[#allocation5 + $0x328] sm:$0xff] }
  0x68   :  { %2177 = vmatprep.subr.bf16.mxu0 %v2176_v20  ;;  %v354_v55 = vld [vmem:[#allocation5 + $0x338] sm:$0xff]  ;;  %v2198_v56 = vpack.c.bf16 %v349_v53, %v347_v52  ;;  %v351_v58 = vld [vmem:[#allocation5 + $0x320] sm:$0xff]  ;;  %v353_v59 = vld [vmem:[#allocation5 + $0x330] sm:$0xff] }
  0x69   :  { %v2200_v57 = vpack.c.bf16 %v354_v55, %v352_v54  ;;  %v356_v60 = vld [vmem:[#allocation5 + $0x348] sm:$0xff]  ;;  %v358_v61 = vld [vmem:[#allocation5 + $0x358] sm:$0xff]  ;;  %v2202_v62 = vpack.c.bf16 %v353_v59, %v351_v58  ;;  %v355_v0 = vld [vmem:[#allocation5 + $0x340] sm:$0xff] }
  0x6a   :  { %v2204_v63 = vpack.c.bf16 %v358_v61, %v356_v60  ;;  %v357_v1 = vld [vmem:[#allocation5 + $0x350] sm:$0xff]  ;;  %v360_v2 = vld [vmem:[#allocation5 + $0x368] sm:$0xff]  ;;  %v362_v3 = vld [vmem:[#allocation5 + $0x378] sm:$0xff] }
  0x6b   :  { %2179 = vmatpush1.bf16.msra.mxu0 %v2178_v25  ;;  %v2206_v4 = vpack.c.bf16 %v357_v1, %v355_v0  ;;  %v2208_v5 = vpack.c.bf16 %v362_v3, %v360_v2  ;;  %v359_v6 = vld [vmem:[#allocation5 + $0x360] sm:$0xff]  ;;  %v361_v7 = vld [vmem:[#allocation5 + $0x370] sm:$0xff]  ;;  %v364_v8 = vld [vmem:[#allocation5 + $0x388] sm:$0xff] }
  0x6c   :  { %2181 = vmatprep.subr.bf16.mxu0 %v2180_v26  ;;  %v366_v9 = vld [vmem:[#allocation5 + $0x398] sm:$0xff]  ;;  %v2210_v10 = vpack.c.bf16 %v361_v7, %v359_v6  ;;  %v363_v12 = vld [vmem:[#allocation5 + $0x380] sm:$0xff]  ;;  %v365_v13 = vld [vmem:[#allocation5 + $0x390] sm:$0xff] }
  0x6d   :  { %v2212_v11 = vpack.c.bf16 %v366_v9, %v364_v8  ;;  %v368_v14 = vld [vmem:[#allocation5 + $0x3a8] sm:$0xff]  ;;  %v370_v15 = vld [vmem:[#allocation5 + $0x3b8] sm:$0xff]  ;;  %v2214_v16 = vpack.c.bf16 %v365_v13, %v363_v12  ;;  %v367_v18 = vld [vmem:[#allocation5 + $0x3a0] sm:$0xff] }
  0x6e   :  { %v2216_v17 = vpack.c.bf16 %v370_v15, %v368_v14  ;;  %v369_v19 = vld [vmem:[#allocation5 + $0x3b0] sm:$0xff]  ;;  %v372_v20 = vld [vmem:[#allocation5 + $0x3c8] sm:$0xff]  ;;  %v374_v21 = vld [vmem:[#allocation5 + $0x3d8] sm:$0xff] }
  0x6f   :  { %2183 = vmatpush1.bf16.msra.mxu0 %v2182_v31  ;;  %v2218_v22 = vpack.c.bf16 %v369_v19, %v367_v18  ;;  %v2220_v23 = vpack.c.bf16 %v374_v21, %v372_v20  ;;  %v371_v24 = vld [vmem:[#allocation5 + $0x3c0] sm:$0xff]  ;;  %v373_v25 = vld [vmem:[#allocation5 + $0x3d0] sm:$0xff]  ;;  %v376_v26 = vld [vmem:[#allocation5 + $0x3e8] sm:$0xff] }
  0x70   :  { %2185 = vmatprep.subr.bf16.mxu0 %v2184_v32  ;;  %v378_v27 = vld [vmem:[#allocation5 + $0x3f8] sm:$0xff]  ;;  %v2222_v28 = vpack.c.bf16 %v373_v25, %v371_v24  ;;  %v375_v30 = vld [vmem:[#allocation5 + $0x3e0] sm:$0xff]  ;;  %v377_v31 = vld [vmem:[#allocation5 + $0x3f0] sm:$0xff] }
  0x71   :  { %v2224_v29 = vpack.c.bf16 %v378_v27, %v376_v26  ;;  %v380_v32 = vld [vmem:[#allocation5 + $0x408] sm:$0xff]  ;;  %v382_v33 = vld [vmem:[#allocation5 + $0x418] sm:$0xff]  ;;  %v2226_v34 = vpack.c.bf16 %v377_v31, %v375_v30  ;;  %v379_v36 = vld [vmem:[#allocation5 + $0x400] sm:$0xff] }
  0x72   :  { %v2228_v35 = vpack.c.bf16 %v382_v33, %v380_v32  ;;  %v386_v39 = vld [vmem:[#allocation5 + $0x438] sm:$0xff]  ;;  %v93_v40 = vld [vmem:[#allocation3 + $0x10] sm:$0xff]  ;;  %v104_v42 = vld [vmem:[#allocation3 + $0x68] sm:$0xff] }
  0x73   :  { %2187 = vmatpush1.bf16.msra.mxu0 %v2186_v37  ;;  %v381_v37 = vld [vmem:[#allocation5 + $0x410] sm:$0xff]  ;;  %v388_v46 = vld [vmem:[#allocation5 + $0x448] sm:$0xff]  ;;  %v390_v47 = vld [vmem:[#allocation5 + $0x458] sm:$0xff] }
  0x74   :  { %2189 = vmatprep.subr.bf16.mxu0 %v2188_v38  ;;  %v384_v38 = vld [vmem:[#allocation5 + $0x428] sm:$0xff]  ;;  %v2230_v41 = vpack.c.bf16 %v381_v37, %v379_v36  ;;  %v103_v48 = vld [vmem:[#allocation3 + $0x60] sm:$0xff]  ;;  %v389_v53 = vld [vmem:[#allocation5 + $0x450] sm:$0xff] }
  0x75   :  { %v2232_v43 = vpack.c.bf16 %v386_v39, %v384_v38  ;;  %v387_v52 = vld [vmem:[#allocation5 + $0x440] sm:$0xff]  ;;  %v392_v54 = vld [vmem:[#allocation5 + $0x468] sm:$0xff]  ;;  %v394_v55 = vld [vmem:[#allocation5 + $0x478] sm:$0xff] }
  0x76   :  { %v124_v58 = vld [vmem:[#allocation3 + $0x108] sm:$0xff]  ;;  %v2240_v59 = vpack.c.bf16 %v394_v55, %v392_v54  ;;  %v391_v60 = vld [vmem:[#allocation5 + $0x460] sm:$0xff]  ;;  %v393_v61 = vld [vmem:[#allocation5 + $0x470] sm:$0xff] }
  0x77   :  { %2191 = vmatpush1.bf16.msra.mxu0 %v2190_v44  ;;  %v383_v44 = vld [vmem:[#allocation5 + $0x420] sm:$0xff]  ;;  %v2242_v1 = vpack.c.bf16 %v393_v61, %v391_v60  ;;  %v134_v2 = vld [vmem:[#allocation3 + $0x158] sm:$0xff]  ;;  %v400_v6 = vld [vmem:[#allocation5 + $0x4a8] sm:$0xff] }
  0x78   :  { %2193 = vmatprep.subr.bf16.mxu0 %v2192_v45  ;;  %v385_v45 = vld [vmem:[#allocation5 + $0x430] sm:$0xff]  ;;  %v123_v0 = vld [vmem:[#allocation3 + $0x100] sm:$0xff]  ;;  %v402_v7 = vld [vmem:[#allocation5 + $0x4b8] sm:$0xff] }
  0x79   :  { %v2234_v49 = vpack.c.bf16 %v385_v45, %v383_v44  ;;  %v133_v8 = vld [vmem:[#allocation3 + $0x150] sm:$0xff]  ;;  %v399_v12 = vld [vmem:[#allocation5 + $0x4a0] sm:$0xff]  ;;  %v404_v14 = vld [vmem:[#allocation5 + $0x4c8] sm:$0xff] }
  0x7a   :  { %v401_v13 = vld [vmem:[#allocation5 + $0x4b0] sm:$0xff]  ;;  %v406_v15 = vld [vmem:[#allocation5 + $0x4d8] sm:$0xff]  ;;  %v403_v19 = vld [vmem:[#allocation5 + $0x4c0] sm:$0xff] }
  0x7b   :  { %2195 = vmatpush1.bf16.msra.mxu0 %v2194_v50  ;;  %v114_v50 = vld [vmem:[#allocation3 + $0xb8] sm:$0xff]  ;;  %v405_v20 = vld [vmem:[#allocation5 + $0x4d0] sm:$0xff]  ;;  %v2252_v21 = vpack.c.bf16 %v406_v15, %v404_v14  ;;  %v251_v27 = vld [vmem:[#allocation5] sm:$0xff] }
  0x7c   :  { %2197 = vmatprep.subr.bf16.mxu0 %v2196_v51  ;;  %v2236_v51 = vpack.c.bf16 %v390_v47, %v388_v46  ;;  %v154_v18 = vld [vmem:[#allocation3 + $0x1f8] sm:$0xff]  ;;  %v164_v30 = vld [vmem:[#allocation3 + $0x248] sm:$0xff]  ;;  %v2254_v32 = vpack.c.bf16 %v405_v20, %v403_v19  ;;  %v407_v33 = vld [vmem:[#allocation5 + $0x4e0] sm:$0xff] }
  0x7d   :  { %v254_v24 = vld [vmem:[#allocation5 + $0x18] sm:$0xff]  ;;  %v255_v38 = vld [vmem:[#allocation5 + $0x20] sm:$0xff]  ;;  %v257_v39 = vld [vmem:[#allocation5 + $0x30] sm:$0xff] }
  0x7e   :  { %v410_v25 = vld [vmem:[#allocation5 + $0x4f8] sm:$0xff]  ;;  %v163_v44 = vld [vmem:[#allocation3 + $0x240] sm:$0xff]  ;;  %v260_v45 = vld [vmem:[#allocation5 + $0x48] sm:$0xff] }
  0x7f   :  { %2199 = vmatpush1.bf16.msra.mxu0 %v2198_v56  ;;  %v113_v56 = vld [vmem:[#allocation3 + $0xb0] sm:$0xff]  ;;  %v258_v37 = vld [vmem:[#allocation5 + $0x38] sm:$0xff]  ;;  %v416_v54 = vld [vmem:[#allocation5 + $0x528] sm:$0xff] }
  0x80   :  { %2201 = vmatprep.subr.bf16.mxu0 %v2200_v57  ;;  %v2238_v57 = vpack.c.bf16 %v389_v53, %v387_v52  ;;  %v262_v46 = vld [vmem:[#allocation5 + $0x58] sm:$0xff]  ;;  %v413_v53 = vld [vmem:[#allocation5 + $0x510] sm:$0xff]  ;;  %v263_v61 = vld [vmem:[#allocation5 + $0x60] sm:$0xff] }
  0x81   :  { %v261_v55 = vld [vmem:[#allocation5 + $0x50] sm:$0xff]  ;;  %v194_v15 = vld [vmem:[#allocation3 + $0x338] sm:$0xff] }
  0x82   :  { %v421_v19 = vld [vmem:[#allocation5 + $0x550] sm:$0xff]  ;;  %v274_v20 = vld [vmem:[#allocation5 + $0xb8] sm:$0xff] }
  0x83   :  { %2203 = vmatpush1.bf16.msra.mxu0 %v2202_v62  ;;  %v396_v62 = vld [vmem:[#allocation5 + $0x488] sm:$0xff] }
  0x84   :  { %2205 = vmatprep.subr.bf16.mxu0 %v2204_v63  ;;  %v398_v63 = vld [vmem:[#allocation5 + $0x498] sm:$0xff] }
  0x85   :  { %v2244_v3 = vpack.c.bf16 %v398_v63, %v396_v62  ;;  %v265_v62 = vld [vmem:[#allocation5 + $0x70] sm:$0xff] }
  0x86   :  { %v173_v63 = vld [vmem:[#allocation3 + $0x290] sm:$0xff] }
  0x87   :  { %2207 = vmatpush1.bf16.msra.mxu0 %v2206_v4  ;;  %v395_v4 = vld [vmem:[#allocation5 + $0x480] sm:$0xff] }
  0x88   :  { %2209 = vmatprep.subr.bf16.mxu0 %v2208_v5  ;;  %v397_v5 = vld [vmem:[#allocation5 + $0x490] sm:$0xff] }
  0x89   :  { %v2246_v9 = vpack.c.bf16 %v397_v5, %v395_v4  ;;  %v417_v4 = vld [vmem:[#allocation5 + $0x530] sm:$0xff]  ;;  %v268_v5 = vld [vmem:[#allocation5 + $0x88] sm:$0xff] }
  0x8b   :  { %2211 = vmatpush1.bf16.msra.mxu0 %v2210_v10  ;;  %v144_v10 = vld [vmem:[#allocation3 + $0x1a8] sm:$0xff] }
  0x8c   :  { %2213 = vmatprep.subr.bf16.mxu0 %v2212_v11  ;;  %v2248_v11 = vpack.c.bf16 %v402_v7, %v400_v6  ;;  %v270_v6 = vld [vmem:[#allocation5 + $0x98] sm:$0xff]  ;;  %v420_v7 = vld [vmem:[#allocation5 + $0x548] sm:$0xff] }
  0x8f   :  { %2215 = vmatpush1.bf16.msra.mxu0 %v2214_v16  ;;  %v143_v16 = vld [vmem:[#allocation3 + $0x1a0] sm:$0xff] }
  0x90   :  { %2217 = vmatprep.subr.bf16.mxu0 %v2216_v17  ;;  %v2250_v17 = vpack.c.bf16 %v401_v13, %v399_v12  ;;  %v269_v12 = vld [vmem:[#allocation5 + $0x90] sm:$0xff]  ;;  %v183_v13 = vld [vmem:[#allocation3 + $0x2e0] sm:$0xff] }
  0x93   :  { %2219 = vmatpush1.bf16.msra.mxu0 %v2218_v22  ;;  %v408_v22 = vld [vmem:[#allocation5 + $0x4e8] sm:$0xff] }
  0x94   :  { %2221 = vmatprep.subr.bf16.mxu0 %v2220_v23  ;;  %v252_v23 = vld [vmem:[#allocation5 + $0x8] sm:$0xff]  ;;  %v2256_v36 = vpack.c.bf16 %v410_v25, %v408_v22  ;;  %v426_v22 = vld [vmem:[#allocation5 + $0x578] sm:$0xff]  ;;  %v271_v25 = vld [vmem:[#allocation5 + $0xa0] sm:$0xff] }
  0x95   :  { %v2100_v26 = vpack.c.bf16 %v254_v24, %v252_v23 }
  0x97   :  { %2223 = vmatpush1.bf16.msra.mxu0 %v2222_v28  ;;  %v253_v28 = vld [vmem:[#allocation5 + $0x10] sm:$0xff]  ;;  %2101 = vmatprep.subr.bf16.mxu1 %v2100_v26 }
  0x98   :  { %2225 = vmatprep.subr.bf16.mxu0 %v2224_v29  ;;  %v153_v29 = vld [vmem:[#allocation3 + $0x1f0] sm:$0xff]  ;;  %v2102_v31 = vpack.c.bf16 %v253_v28, %v251_v27 }
  0x99   :  { %v273_v26 = vld [vmem:[#allocation5 + $0xb0] sm:$0xff] }
  0x9a   :  { %2103 = vmatpush1.bf16.msra.mxu1 %v2102_v31  ;;  %v193_v27 = vld [vmem:[#allocation3 + $0x330] sm:$0xff]  ;;  %v204_v31 = vld [vmem:[#allocation3 + $0x388] sm:$0xff] }
  0x9b   :  { %2227 = vmatpush1.bf16.msra.mxu0 %v2226_v34  ;;  %v409_v34 = vld [vmem:[#allocation5 + $0x4f0] sm:$0xff] }
  0x9c   :  { %2229 = vmatprep.subr.bf16.mxu0 %v2228_v35  ;;  %v256_v35 = vld [vmem:[#allocation5 + $0x28] sm:$0xff]  ;;  %v2258_v47 = vpack.c.bf16 %v409_v34, %v407_v33  ;;  %v423_v33 = vld [vmem:[#allocation5 + $0x560] sm:$0xff]  ;;  %v425_v34 = vld [vmem:[#allocation5 + $0x570] sm:$0xff] }
  0x9e   :  { %851 = vmatmul.mubr.f32.vlgmr.msra.gmra.mrb[0].mxu0 %v93_v40  ;;  %v412_v40 = vld [vmem:[#allocation5 + $0x508] sm:$0xff] }
  0x9f   :  { %2231 = vmatpush1.bf16.msra.mxu0 %v2230_v41  ;;  %856 = vmatprep.mubr.f32.mxu0 %v104_v42  ;;  %v414_v41 = vld [vmem:[#allocation5 + $0x518] sm:$0xff]  ;;  %v2104_v42 = vpack.c.bf16 %v258_v37, %v256_v35  ;;  %v428_v35 = vld [vmem:[#allocation5 + $0x588] sm:$0xff]  ;;  %v2122_v37 = vpack.c.bf16 %v273_v26, %v271_v25  ;;  %v439_v25 = vld [vmem:[#allocation5 + $0x5e0] sm:$0xff] }
  0xa0   :  { %2233 = vmatprep.subr.bf16.mxu0 %v2232_v43  ;;  %v2106_v43 = vpack.c.bf16 %v257_v39, %v255_v38  ;;  %v2260_v52 = vpack.c.bf16 %v414_v41, %v412_v40  ;;  %v275_v39 = vld [vmem:[#allocation5 + $0xc0] sm:$0xff]  ;;  %v277_v40 = vld [vmem:[#allocation5 + $0xd0] sm:$0xff] }
  0xa1   :  { %2105 = vmatprep.subr.bf16.mxu1 %v2104_v42  ;;  %v203_v41 = vld [vmem:[#allocation3 + $0x380] sm:$0xff]  ;;  %v2274_v42 = vpack.c.bf16 %v425_v34, %v423_v33  ;;  %v441_v26 = vld [vmem:[#allocation5 + $0x5f0] sm:$0xff] }
  0xa2   :  { %857 = vmatmul.mubr.f32.gmra.mrb[2].mxu0 %v103_v48  ;;  %v174_v48 = vld [vmem:[#allocation3 + $0x298] sm:$0xff]  ;;  %2107 = vmatpush1.bf16.msra.mxu1 %v2106_v43  ;;  %v280_v43 = vld [vmem:[#allocation5 + $0xe8] sm:$0xff]  ;;  %v243_v33 = vld [vmem:[#allocation3 + $0x4c0] sm:$0xff]  ;;  %v2290_v34 = vpack.c.bf16 %v441_v26, %v439_v25 }
  0xa3   :  { %2235 = vmatpush1.bf16.msra.mxu0 %v2234_v49  ;;  %862 = vmatprep.mubr.f32.mxu0 %v114_v50  ;;  %v411_v49 = vld [vmem:[#allocation5 + $0x500] sm:$0xff]  ;;  %v2108_v50 = vpack.c.bf16 %v262_v46, %v260_v45  ;;  %v214_v45 = vld [vmem:[#allocation3 + $0x3d8] sm:$0xff]  ;;  %v309_v25 = vld [vmem:[#allocation5 + $0x1d0] sm:$0xff] }
  0xa4   :  { %2237 = vmatprep.subr.bf16.mxu0 %v2236_v51  ;;  %v259_v51 = vld [vmem:[#allocation5 + $0x40] sm:$0xff]  ;;  %v125_v26 = vld [vmem:[#allocation3 + $0x110] sm:$0xff] }
  0xa5   :  { %2109 = vmatprep.subr.bf16.mxu1 %v2108_v50  ;;  %v434_v50 = vld [vmem:[#allocation5 + $0x5b8] sm:$0xff] }
  0xa6   :  { %863 = vmatmul.mubr.f32.gmra.mrb[4].mxu0 %v113_v56  ;;  %v418_v56 = vld [vmem:[#allocation5 + $0x538] sm:$0xff] }
  0xa7   :  { %2239 = vmatpush1.bf16.msra.mxu0 %v2238_v57  ;;  %868 = vmatprep.mubr.f32.mxu0 %v124_v58  ;;  %v2110_v57 = vpack.c.bf16 %v261_v55, %v259_v51  ;;  %v264_v58 = vld [vmem:[#allocation5 + $0x68] sm:$0xff]  ;;  %v2126_v51 = vpack.c.bf16 %v277_v40, %v275_v39  ;;  %v213_v55 = vld [vmem:[#allocation3 + $0x3d0] sm:$0xff]  ;;  %v443_v39 = vld [vmem:[#allocation5 + $0x600] sm:$0xff] }
  0xa8   :  { %2241 = vmatprep.subr.bf16.mxu0 %v2240_v59  ;;  %v266_v59 = vld [vmem:[#allocation5 + $0x78] sm:$0xff]  ;;  %v445_v40 = vld [vmem:[#allocation5 + $0x610] sm:$0xff] }
  0xa9   :  { %v2112_v60 = vpack.c.bf16 %v266_v59, %v264_v58  ;;  %2111 = vmatpush1.bf16.msra.mxu1 %v2110_v57  ;;  %v284_v57 = vld [vmem:[#allocation5 + $0x108] sm:$0xff]  ;;  %v286_v58 = vld [vmem:[#allocation5 + $0x118] sm:$0xff] }
  0xaa   :  { %869 = vmatmul.mubr.f32.gmra.mrb[6].mxu0 %v123_v0  ;;  %v2262_v0 = vpack.c.bf16 %v413_v53, %v411_v49  ;;  %v432_v49 = vld [vmem:[#allocation5 + $0x5a8] sm:$0xff]  ;;  %v279_v53 = vld [vmem:[#allocation5 + $0xe0] sm:$0xff] }
  0xab   :  { %2243 = vmatpush1.bf16.msra.mxu0 %v2242_v1  ;;  %874 = vmatprep.mubr.f32.mxu0 %v134_v2  ;;  %v184_v1 = vld [vmem:[#allocation3 + $0x2e8] sm:$0xff]  ;;  %v415_v2 = vld [vmem:[#allocation5 + $0x520] sm:$0xff] }
  0xac   :  { %2245 = vmatprep.subr.bf16.mxu0 %v2244_v3  ;;  %v2264_v3 = vpack.c.bf16 %v418_v56, %v416_v54  ;;  %2113 = vmatprep.subr.bf16.mxu1 %v2112_v60  ;;  %v2266_v14 = vpack.c.bf16 %v417_v4, %v415_v2  ;;  %v281_v54 = vld [vmem:[#allocation5 + $0xf0] sm:$0xff]  ;;  %v224_v59 = vld [vmem:[#allocation3 + $0x428] sm:$0xff]  ;;  %v2280_v60 = vpack.c.bf16 %v434_v50, %v432_v49  ;;  %v302_v50 = vld [vmem:[#allocation5 + $0x198] sm:$0xff] }
  0xad   :  { %v2132_v2 = vpack.c.bf16 %v286_v58, %v284_v57  ;;  %v285_v4 = vld [vmem:[#allocation5 + $0x110] sm:$0xff]  ;;  %v300_v49 = vld [vmem:[#allocation5 + $0x188] sm:$0xff] }
  0xae   :  { %875 = vmatmul.mubr.f32.gmra.mrb[8].mxu0 %v133_v8  ;;  %v422_v8 = vld [vmem:[#allocation5 + $0x558] sm:$0xff]  ;;  %v105_v58 = vld [vmem:[#allocation3 + $0x70] sm:$0xff] }
  0xaf   :  { %2247 = vmatpush1.bf16.msra.mxu0 %v2246_v9  ;;  %880 = vmatprep.mubr.f32.mxu0 %v144_v10  ;;  %v2114_v9 = vpack.c.bf16 %v265_v62, %v263_v61  ;;  %v2116_v10 = vpack.c.bf16 %v270_v6, %v268_v5  ;;  %v431_v61 = vld [vmem:[#allocation5 + $0x5a0] sm:$0xff]  ;;  %v433_v62 = vld [vmem:[#allocation5 + $0x5b0] sm:$0xff] }
  0xb0   :  { %2249 = vmatprep.subr.bf16.mxu0 %v2248_v11  ;;  %v267_v11 = vld [vmem:[#allocation5 + $0x80] sm:$0xff]  ;;  %v2282_v6 = vpack.c.bf16 %v433_v62, %v431_v61  ;;  %v301_v61 = vld [vmem:[#allocation5 + $0x190] sm:$0xff] }
  0xb1   :  { %2115 = vmatpush1.bf16.msra.mxu1 %v2114_v9  ;;  %v2118_v23 = vpack.c.bf16 %v269_v12, %v267_v11  ;;  %v223_v5 = vld [vmem:[#allocation3 + $0x420] sm:$0xff]  ;;  %v234_v9 = vld [vmem:[#allocation3 + $0x478] sm:$0xff]  ;;  %v437_v12 = vld [vmem:[#allocation5 + $0x5d0] sm:$0xff] }
  0xb2   :  { %881 = vmatmul.mubr.f32.gmra.mrb[10].mxu0 %v143_v16  ;;  %v272_v16 = vld [vmem:[#allocation5 + $0xa8] sm:$0xff]  ;;  %2117 = vmatprep.subr.bf16.mxu1 %v2116_v10  ;;  %v435_v11 = vld [vmem:[#allocation5 + $0x5c0] sm:$0xff] }
  0xb3   :  { %2251 = vmatpush1.bf16.msra.mxu0 %v2250_v17  ;;  %886 = vmatprep.mubr.f32.mxu0 %v154_v18  ;;  %v2268_v17 = vpack.c.bf16 %v422_v8, %v420_v7  ;;  %v419_v18 = vld [vmem:[#allocation5 + $0x540] sm:$0xff]  ;;  %v2120_v24 = vpack.c.bf16 %v274_v20, %v272_v16  ;;  %v288_v7 = vld [vmem:[#allocation5 + $0x128] sm:$0xff]  ;;  %v290_v8 = vld [vmem:[#allocation5 + $0x138] sm:$0xff]  ;;  %v2286_v20 = vpack.c.bf16 %v437_v12, %v435_v11 }
  0xb4   :  { %2253 = vmatprep.subr.bf16.mxu0 %v2252_v21  ;;  %v424_v21 = vld [vmem:[#allocation5 + $0x568] sm:$0xff]  ;;  %v2270_v28 = vpack.c.bf16 %v421_v19, %v419_v18  ;;  %v2136_v16 = vpack.c.bf16 %v290_v8, %v288_v7  ;;  %v289_v18 = vld [vmem:[#allocation5 + $0x130] sm:$0xff]  ;;  %v458_v7 = vld [vmem:[#allocation5 + $0x678] sm:$0xff] }
  0xb5   :  { %2119 = vmatpush1.bf16.msra.mxu1 %v2118_v23  ;;  %v233_v19 = vld [vmem:[#allocation3 + $0x470] sm:$0xff]  ;;  %v244_v23 = vld [vmem:[#allocation3 + $0x4c8] sm:$0xff]  ;;  %v115_v12 = vld [vmem:[#allocation3 + $0xc0] sm:$0xff] }
  0xb6   :  { %887 = vmatmul.mubr.f32.gmra.mrb[12].mxu0 %v153_v29  ;;  %v276_v29 = vld [vmem:[#allocation5 + $0xc8] sm:$0xff]  ;;  %2121 = vmatprep.subr.bf16.mxu1 %v2120_v24  ;;  %v305_v11 = vld [vmem:[#allocation5 + $0x1b0] sm:$0xff] }
  0xb7   :  { %2255 = vmatpush1.bf16.msra.mxu0 %v2254_v32  ;;  %892 = vmatprep.mubr.f32.mxu0 %v164_v30  ;;  %v278_v30 = vld [vmem:[#allocation5 + $0xd8] sm:$0xff]  ;;  %v2272_v32 = vpack.c.bf16 %v426_v22, %v424_v21  ;;  %v292_v21 = vld [vmem:[#allocation5 + $0x148] sm:$0xff] }
  0xb8   :  { %2257 = vmatprep.subr.bf16.mxu0 %v2256_v36  ;;  %v430_v36 = vld [vmem:[#allocation5 + $0x598] sm:$0xff]  ;;  %v2124_v38 = vpack.c.bf16 %v278_v30, %v276_v29 }
  0xb9   :  { %v2276_v46 = vpack.c.bf16 %v430_v36, %v428_v35  ;;  %2123 = vmatpush1.bf16.msra.mxu1 %v2122_v37  ;;  %v294_v22 = vld [vmem:[#allocation5 + $0x158] sm:$0xff]  ;;  %v296_v35 = vld [vmem:[#allocation5 + $0x168] sm:$0xff] }
  0xba   :  { %893 = vmatmul.mubr.f32.gmra.mrb[14].mxu0 %v163_v44  ;;  %v282_v44 = vld [vmem:[#allocation5 + $0xf8] sm:$0xff]  ;;  %2125 = vmatprep.subr.bf16.mxu1 %v2124_v38  ;;  %v2140_v30 = vpack.c.bf16 %v294_v22, %v292_v21  ;;  %v96_v37 = vld [vmem:[#allocation3 + $0x28] sm:$0xff] }
  0xbb   :  { %2259 = vmatpush1.bf16.msra.mxu0 %v2258_v47  ;;  %898 = vmatprep.mubr.f32.mxu0 %v174_v48  ;;  %v427_v47 = vld [vmem:[#allocation5 + $0x580] sm:$0xff]  ;;  %v429_v48 = vld [vmem:[#allocation5 + $0x590] sm:$0xff]  ;;  %v298_v36 = vld [vmem:[#allocation5 + $0x178] sm:$0xff] }
  0xbc   :  { %2261 = vmatprep.subr.bf16.mxu0 %v2260_v52  ;;  %v2128_v52 = vpack.c.bf16 %v282_v44, %v280_v43  ;;  %v2278_v56 = vpack.c.bf16 %v429_v48, %v427_v47  ;;  %v2144_v44 = vpack.c.bf16 %v298_v36, %v296_v35  ;;  %v95_v47 = vld [vmem:[#allocation3 + $0x20] sm:$0xff]  ;;  %v2294_v48 = vpack.c.bf16 %v445_v40, %v443_v39  ;;  %v462_v21 = vld [vmem:[#allocation5 + $0x698] sm:$0xff]  ;;  %v313_v39 = vld [vmem:[#allocation5 + $0x1f0] sm:$0xff] }
  0xbd   :  { %2127 = vmatpush1.bf16.msra.mxu1 %v2126_v51  ;;  %v106_v51 = vld [vmem:[#allocation3 + $0x78] sm:$0xff]  ;;  %v135_v40 = vld [vmem:[#allocation3 + $0x160] sm:$0xff] }
  0xbe   :  { %899 = vmatmul.mubr.f32.gmra.mrb[16].mxu0 %v173_v63  ;;  %v436_v63 = vld [vmem:[#allocation5 + $0x5c8] sm:$0xff]  ;;  %2129 = vmatprep.subr.bf16.mxu1 %v2128_v52  ;;  %v466_v35 = vld [vmem:[#allocation5 + $0x6b8] sm:$0xff] }
  0xbf   :  { %2263 = vmatpush1.bf16.msra.mxu0 %v2262_v0  ;;  %904 = vmatprep.mubr.f32.mxu0 %v184_v1  ;;  %v438_v0 = vld [vmem:[#allocation5 + $0x5d8] sm:$0xff]  ;;  %v2130_v1 = vpack.c.bf16 %v281_v54, %v279_v53  ;;  %v447_v53 = vld [vmem:[#allocation5 + $0x620] sm:$0xff]  ;;  %v449_v54 = vld [vmem:[#allocation5 + $0x630] sm:$0xff] }
  0xc0   :  { %2265 = vmatprep.subr.bf16.mxu0 %v2264_v3  ;;  %v283_v3 = vld [vmem:[#allocation5 + $0x100] sm:$0xff]  ;;  %v2284_v10 = vpack.c.bf16 %v438_v0, %v436_v63  ;;  %v2298_v62 = vpack.c.bf16 %v449_v54, %v447_v53  ;;  %v116_v63 = vld [vmem:[#allocation3 + $0xc8] sm:$0xff]  ;;  %v469_v54 = vld [vmem:[#allocation5 + $0x6d0] sm:$0xff] }
  0xc1   :  { %2131 = vmatpush1.bf16.msra.mxu1 %v2130_v1  ;;  %v304_v0 = vld [vmem:[#allocation5 + $0x1a8] sm:$0xff]  ;;  %v306_v1 = vld [vmem:[#allocation5 + $0x1b8] sm:$0xff]  ;;  %v467_v53 = vld [vmem:[#allocation5 + $0x6c0] sm:$0xff] }
  0xc2   :  { %905 = vmatmul.mubr.f32.gmra.mrb[18].mxu0 %v183_v13  ;;  %v440_v13 = vld [vmem:[#allocation5 + $0x5e8] sm:$0xff]  ;;  %2133 = vmatprep.subr.bf16.mxu1 %v2132_v2 }
  0xc3   :  { %2267 = vmatpush1.bf16.msra.mxu0 %v2266_v14  ;;  %910 = vmatprep.mubr.f32.mxu0 %v194_v15  ;;  %v442_v14 = vld [vmem:[#allocation5 + $0x5f8] sm:$0xff]  ;;  %v2134_v15 = vpack.c.bf16 %v285_v4, %v283_v3  ;;  %v451_v3 = vld [vmem:[#allocation5 + $0x640] sm:$0xff]  ;;  %v453_v4 = vld [vmem:[#allocation5 + $0x650] sm:$0xff] }
  0xc4   :  { %2269 = vmatprep.subr.bf16.mxu0 %v2268_v17  ;;  %v287_v17 = vld [vmem:[#allocation5 + $0x120] sm:$0xff]  ;;  %v2288_v24 = vpack.c.bf16 %v442_v14, %v440_v13  ;;  %v2302_v13 = vpack.c.bf16 %v453_v4, %v451_v3  ;;  %v308_v14 = vld [vmem:[#allocation5 + $0x1c8] sm:$0xff]  ;;  %v101_v3 = vld [vmem:[#allocation3 + $0x50] sm:$0xff] }
  0xc5   :  { %2135 = vmatpush1.bf16.msra.mxu1 %v2134_v15  ;;  %v2138_v29 = vpack.c.bf16 %v289_v18, %v287_v17  ;;  %v310_v15 = vld [vmem:[#allocation5 + $0x1d8] sm:$0xff]  ;;  %v455_v18 = vld [vmem:[#allocation5 + $0x660] sm:$0xff]  ;;  %v112_v4 = vld [vmem:[#allocation3 + $0xa8] sm:$0xff] }
  0xc6   :  { %911 = vmatmul.mubr.f32.gmra.mrb[20].mxu0 %v193_v27  ;;  %v444_v27 = vld [vmem:[#allocation5 + $0x608] sm:$0xff]  ;;  %2137 = vmatprep.subr.bf16.mxu1 %v2136_v16  ;;  %v126_v16 = vld [vmem:[#allocation3 + $0x118] sm:$0xff] }
  0xc7   :  { %2271 = vmatpush1.bf16.msra.mxu0 %v2270_v28  ;;  %916 = vmatprep.mubr.f32.mxu0 %v204_v31  ;;  %v446_v28 = vld [vmem:[#allocation5 + $0x618] sm:$0xff]  ;;  %v291_v31 = vld [vmem:[#allocation5 + $0x140] sm:$0xff] }
  0xc8   :  { %2273 = vmatprep.subr.bf16.mxu0 %v2272_v32  ;;  %v293_v32 = vld [vmem:[#allocation5 + $0x150] sm:$0xff]  ;;  %v2292_v38 = vpack.c.bf16 %v446_v28, %v444_v27  ;;  %v312_v28 = vld [vmem:[#allocation5 + $0x1e8] sm:$0xff] }
  0xc9   :  { %2139 = vmatpush1.bf16.msra.mxu1 %v2138_v29  ;;  %v2142_v43 = vpack.c.bf16 %v293_v32, %v291_v31  ;;  %v314_v29 = vld [vmem:[#allocation5 + $0x1f8] sm:$0xff]  ;;  %v459_v32 = vld [vmem:[#allocation5 + $0x680] sm:$0xff] }
  0xca   :  { %917 = vmatmul.mubr.f32.gmra.mrb[22].mxu0 %v203_v41  ;;  %v448_v41 = vld [vmem:[#allocation5 + $0x628] sm:$0xff]  ;;  %2141 = vmatprep.subr.bf16.mxu1 %v2140_v30 }
  0xcb   :  { %2275 = vmatpush1.bf16.msra.mxu0 %v2274_v42  ;;  %922 = vmatprep.mubr.f32.mxu0 %v214_v45  ;;  %v450_v42 = vld [vmem:[#allocation5 + $0x638] sm:$0xff]  ;;  %v295_v45 = vld [vmem:[#allocation5 + $0x160] sm:$0xff]  ;;  %v136_v30 = vld [vmem:[#allocation3 + $0x168] sm:$0xff] }
  0xcc   :  { %2277 = vmatprep.subr.bf16.mxu0 %v2276_v46  ;;  %v297_v46 = vld [vmem:[#allocation5 + $0x170] sm:$0xff]  ;;  %v2296_v52 = vpack.c.bf16 %v450_v42, %v448_v41  ;;  %v146_v42 = vld [vmem:[#allocation3 + $0x1b8] sm:$0xff] }
  0xcd   :  { %2143 = vmatpush1.bf16.msra.mxu1 %v2142_v43  ;;  %v2146_v57 = vpack.c.bf16 %v297_v46, %v295_v45  ;;  %v465_v45 = vld [vmem:[#allocation5 + $0x6b0] sm:$0xff]  ;;  %v468_v46 = vld [vmem:[#allocation5 + $0x6c8] sm:$0xff] }
  0xce   :  { %923 = vmatmul.mubr.f32.gmra.mrb[24].mxu0 %v213_v55  ;;  %v452_v55 = vld [vmem:[#allocation5 + $0x648] sm:$0xff]  ;;  %2145 = vmatprep.subr.bf16.mxu1 %v2144_v44  ;;  %v463_v44 = vld [vmem:[#allocation5 + $0x6a0] sm:$0xff] }
  0xcf   :  { %2279 = vmatpush1.bf16.msra.mxu0 %v2278_v56  ;;  %928 = vmatprep.mubr.f32.mxu0 %v224_v59  ;;  %v454_v56 = vld [vmem:[#allocation5 + $0x658] sm:$0xff]  ;;  %v2148_v59 = vpack.c.bf16 %v302_v50, %v300_v49  ;;  %v145_v49 = vld [vmem:[#allocation3 + $0x1b0] sm:$0xff]  ;;  %v2314_v50 = vpack.c.bf16 %v465_v45, %v463_v44  ;;  %v152_v44 = vld [vmem:[#allocation3 + $0x1e8] sm:$0xff] }
  0xd0   :  { %2281 = vmatprep.subr.bf16.mxu0 %v2280_v60  ;;  %v299_v60 = vld [vmem:[#allocation5 + $0x180] sm:$0xff]  ;;  %v2300_v2 = vpack.c.bf16 %v454_v56, %v452_v55  ;;  %v472_v55 = vld [vmem:[#allocation5 + $0x6e8] sm:$0xff]  ;;  %v474_v56 = vld [vmem:[#allocation5 + $0x6f8] sm:$0xff] }
  0xd1   :  { %2147 = vmatpush1.bf16.msra.mxu1 %v2146_v57  ;;  %v2150_v8 = vpack.c.bf16 %v301_v61, %v299_v60  ;;  %v91_v57 = vld [vmem:[#allocation3] sm:$0xff]  ;;  %v2318_v60 = vpack.c.bf16 %v469_v54, %v467_v53  ;;  %v166_v61 = vld [vmem:[#allocation3 + $0x258] sm:$0xff]  ;;  %v205_v45 = vld [vmem:[#allocation3 + $0x390] sm:$0xff] }
  0xd2   :  { %929 = vmatmul.mubr.f32.gmra.mrb[26].mxu0 %v223_v5  ;;  %v92_v5 = vld [vmem:[#allocation3 + $0x8] sm:$0xff]  ;;  %2149 = vmatprep.subr.bf16.mxu1 %v2148_v59  ;;  %v155_v59 = vld [vmem:[#allocation3 + $0x200] sm:$0xff]  ;;  %v162_v54 = vld [vmem:[#allocation3 + $0x238] sm:$0xff] }
  0xd3   :  { %2283 = vmatpush1.bf16.msra.mxu0 %v2282_v6  ;;  %934 = vmatprep.mubr.f32.mxu0 %v234_v9  ;;  %v456_v6 = vld [vmem:[#allocation5 + $0x668] sm:$0xff]  ;;  %v2152_v9 = vpack.c.bf16 %v306_v1, %v304_v0  ;;  %v473_v0 = vld [vmem:[#allocation5 + $0x6f0] sm:$0xff]  ;;  %v151_v53 = vld [vmem:[#allocation3 + $0x1e0] sm:$0xff] }
  0xd4   :  { %2285 = vmatprep.subr.bf16.mxu0 %v2284_v10  ;;  %689 = vmatprep.mubr.f32.mxu1 %v92_v5  ;;  %v303_v10 = vld [vmem:[#allocation5 + $0x1a0] sm:$0xff]  ;;  %v2304_v17 = vpack.c.bf16 %v458_v7, %v456_v6  ;;  %v476_v1 = vld [vmem:[#allocation5 + $0x708] sm:$0xff]  ;;  %v165_v5 = vld [vmem:[#allocation3 + $0x250] sm:$0xff] }
  0xd5   :  { %2151 = vmatpush1.bf16.msra.mxu1 %v2150_v8  ;;  %v2154_v22 = vpack.c.bf16 %v305_v11, %v303_v10  ;;  %v176_v7 = vld [vmem:[#allocation3 + $0x2a8] sm:$0xff]  ;;  %v477_v10 = vld [vmem:[#allocation5 + $0x710] sm:$0xff] }
  0xd6   :  { %935 = vmatmul.mubr.f32.gmra.mrb[28].mxu0 %v233_v19  ;;  %v457_v19 = vld [vmem:[#allocation5 + $0x670] sm:$0xff]  ;;  %2153 = vmatprep.subr.bf16.mxu1 %v2152_v9  ;;  %v475_v9 = vld [vmem:[#allocation5 + $0x700] sm:$0xff]  ;;  %v480_v11 = vld [vmem:[#allocation5 + $0x728] sm:$0xff] }
  0xd7   :  { %2287 = vmatpush1.bf16.msra.mxu0 %v2286_v20  ;;  %940 = vmatprep.mubr.f32.mxu0 %v244_v23  ;;  %v460_v20 = vld [vmem:[#allocation5 + $0x688] sm:$0xff]  ;;  %v2156_v23 = vpack.c.bf16 %v310_v15, %v308_v14  ;;  %v2306_v27 = vpack.c.bf16 %v457_v19, %v455_v18  ;;  %v122_v14 = vld [vmem:[#allocation3 + $0xf8] sm:$0xff]  ;;  %v175_v15 = vld [vmem:[#allocation3 + $0x2a0] sm:$0xff] }
  0xd8   :  { %2289 = vmatprep.subr.bf16.mxu0 %v2288_v24  ;;  %v307_v24 = vld [vmem:[#allocation5 + $0x1c0] sm:$0xff]  ;;  %v2308_v31 = vpack.c.bf16 %v462_v21, %v460_v20  ;;  %v481_v20 = vld [vmem:[#allocation5 + $0x730] sm:$0xff]  ;;  %v484_v21 = vld [vmem:[#allocation5 + $0x748] sm:$0xff] }
  0xd9   :  { %2155 = vmatpush1.bf16.msra.mxu1 %v2154_v22  ;;  %v2158_v36 = vpack.c.bf16 %v309_v25, %v307_v24  ;;  %v479_v19 = vld [vmem:[#allocation5 + $0x720] sm:$0xff]  ;;  %v486_v22 = vld [vmem:[#allocation5 + $0x758] sm:$0xff]  ;;  %v132_v24 = vld [vmem:[#allocation3 + $0x148] sm:$0xff] }
  0xda   :  { %941 = vmatmul.mubr.f32.gmra.mrb[30].mxu0 %v243_v33  ;;  %v461_v33 = vld [vmem:[#allocation5 + $0x690] sm:$0xff]  ;;  %2157 = vmatprep.subr.bf16.mxu1 %v2156_v23 }
  0xdb   :  { %2291 = vmatpush1.bf16.msra.mxu0 %v2290_v34  ;;  %1011 = vmatprep.mubr.f32.mxu0 %v96_v37  ;;  %v464_v34 = vld [vmem:[#allocation5 + $0x6a8] sm:$0xff]  ;;  %v2160_v37 = vpack.c.bf16 %v314_v29, %v312_v28  ;;  %v2310_v41 = vpack.c.bf16 %v461_v33, %v459_v32  ;;  %v121_v23 = vld [vmem:[#allocation3 + $0xf0] sm:$0xff]  ;;  %v2332_v28 = vpack.c.bf16 %v486_v22, %v484_v21  ;;  %v483_v29 = vld [vmem:[#allocation5 + $0x740] sm:$0xff] }
  0xdc   :  { %2293 = vmatprep.subr.bf16.mxu0 %v2292_v38  ;;  %v311_v38 = vld [vmem:[#allocation5 + $0x1e0] sm:$0xff]  ;;  %v2312_v43 = vpack.c.bf16 %v466_v35, %v464_v34  ;;  %v185_v25 = vld [vmem:[#allocation3 + $0x2f0] sm:$0xff]  ;;  %v490_v32 = vld [vmem:[#allocation5 + $0x778] sm:$0xff] }
  0xdd   :  { %2159 = vmatpush1.bf16.msra.mxu1 %v2158_v36  ;;  %v131_v33 = vld [vmem:[#allocation3 + $0x140] sm:$0xff]  ;;  %v142_v34 = vld [vmem:[#allocation3 + $0x198] sm:$0xff]  ;;  %v245_v21 = vld [vmem:[#allocation3 + $0x4d0] sm:$0xff] }
  0xde   :  { %1012 = vmatmul.mubr.f32.vlgmr.msra.gmra.mrb[0].mxu0 %v95_v47  ;;  %v470_v47 = vld [vmem:[#allocation5 + $0x6d8] sm:$0xff]  ;;  %2161 = vmatprep.subr.bf16.mxu1 %v2160_v37  ;;  %v195_v35 = vld [vmem:[#allocation3 + $0x340] sm:$0xff] }
  0xdf   :  { %2295 = vmatpush1.bf16.msra.mxu0 %v2294_v48  ;;  %1017 = vmatprep.mubr.f32.mxu0 %v106_v51  ;;  %v2162_v48 = vpack.c.bf16 %v313_v39, %v311_v38  ;;  %v156_v51 = vld [vmem:[#allocation3 + $0x208] sm:$0xff]  ;;  %v206_v37 = vld [vmem:[#allocation3 + $0x398] sm:$0xff]  ;;  %v487_v39 = vld [vmem:[#allocation5 + $0x760] sm:$0xff] }
  0xe0   :  { %2297 = vmatprep.subr.bf16.mxu0 %v2296_v52  ;;  %v2316_v52 = vpack.c.bf16 %v470_v47, %v468_v46  ;;  %v216_v47 = vld [vmem:[#allocation3 + $0x3e8] sm:$0xff] }
  0xe1   :  { %2163 = vmatpush1.bf16.msra.mxu1 %v2162_v48 }
  0xe2   :  { %1018 = vmatmul.mubr.f32.gmra.mrb[2].mxu0 %v105_v58  ;;  %v102_v58 = vld [vmem:[#allocation3 + $0x58] sm:$0xff] }
  0xe3   :  { %2299 = vmatpush1.bf16.msra.mxu0 %v2298_v62  ;;  %1023 = vmatprep.mubr.f32.mxu0 %v116_v63  ;;  %v2320_v62 = vpack.c.bf16 %v474_v56, %v472_v55  ;;  %v471_v63 = vld [vmem:[#allocation5 + $0x6e0] sm:$0xff] }
  0xe4   :  { %2301 = vmatprep.subr.bf16.mxu0 %v2300_v2  ;;  %690 = vmatmul.mubr.f32.vlgmr.msra.gmra.mrb[0].mxu1 %v91_v57  ;;  %v478_v2 = vld [vmem:[#allocation5 + $0x718] sm:$0xff]  ;;  %v2322_v6 = vpack.c.bf16 %v473_v0, %v471_v63  ;;  %v215_v55 = vld [vmem:[#allocation3 + $0x3e0] sm:$0xff]  ;;  %v161_v63 = vld [vmem:[#allocation3 + $0x230] sm:$0xff] }
  0xe5   :  { %695 = vmatprep.mubr.f32.mxu1 %v102_v58  ;;  %v2324_v8 = vpack.c.bf16 %v478_v2, %v476_v1  ;;  %v226_v57 = vld [vmem:[#allocation3 + $0x438] sm:$0xff]  ;;  %v172_v0 = vld [vmem:[#allocation3 + $0x288] sm:$0xff]  ;;  %v225_v1 = vld [vmem:[#allocation3 + $0x430] sm:$0xff] }
  0xe6   :  { %1024 = vmatmul.mubr.f32.gmra.mrb[4].mxu0 %v115_v12  ;;  %v482_v12 = vld [vmem:[#allocation5 + $0x738] sm:$0xff] }
  0xe7   :  { %2303 = vmatpush1.bf16.msra.mxu0 %v2302_v13  ;;  %1029 = vmatprep.mubr.f32.mxu0 %v126_v16  ;;  %v111_v13 = vld [vmem:[#allocation3 + $0xa0] sm:$0xff]  ;;  %v2326_v16 = vpack.c.bf16 %v477_v10, %v475_v9  ;;  %v2328_v18 = vpack.c.bf16 %v482_v12, %v480_v11  ;;  %v182_v10 = vld [vmem:[#allocation3 + $0x2d8] sm:$0xff] }
  0xe8   :  { %2305 = vmatprep.subr.bf16.mxu0 %v2304_v17  ;;  %696 = vmatmul.mubr.f32.gmra.mrb[2].mxu1 %v101_v3  ;;  %v186_v17 = vld [vmem:[#allocation3 + $0x2f8] sm:$0xff]  ;;  %v236_v3 = vld [vmem:[#allocation3 + $0x488] sm:$0xff]  ;;  %v171_v9 = vld [vmem:[#allocation3 + $0x280] sm:$0xff] }
  0xe9   :  { %701 = vmatprep.mubr.f32.mxu1 %v112_v4  ;;  %v235_v11 = vld [vmem:[#allocation3 + $0x480] sm:$0xff] }
  0xea   :  { %1030 = vmatmul.mubr.f32.gmra.mrb[6].mxu0 %v125_v26  ;;  %v2330_v26 = vpack.c.bf16 %v481_v20, %v479_v19  ;;  %v181_v19 = vld [vmem:[#allocation3 + $0x2d0] sm:$0xff]  ;;  %v192_v20 = vld [vmem:[#allocation3 + $0x328] sm:$0xff] }
  0xeb   :  { %2307 = vmatpush1.bf16.msra.mxu0 %v2306_v27  ;;  %1035 = vmatprep.mubr.f32.mxu0 %v136_v30  ;;  %v196_v27 = vld [vmem:[#allocation3 + $0x348] sm:$0xff]  ;;  %v485_v30 = vld [vmem:[#allocation5 + $0x750] sm:$0xff] }
  0xec   :  { %2309 = vmatprep.subr.bf16.mxu0 %v2308_v31  ;;  %702 = vmatmul.mubr.f32.gmra.mrb[4].mxu1 %v111_v13  ;;  %v488_v31 = vld [vmem:[#allocation5 + $0x768] sm:$0xff]  ;;  %v2334_v36 = vpack.c.bf16 %v485_v30, %v483_v29  ;;  %v246_v13 = vld [vmem:[#allocation3 + $0x4d8] sm:$0xff]  ;;  %v191_v30 = vld [vmem:[#allocation3 + $0x320] sm:$0xff] }
  0xed   :  { %707 = vmatprep.mubr.f32.mxu1 %v122_v14  ;;  %v2336_v38 = vpack.c.bf16 %v490_v32, %v488_v31  ;;  %v514_v29 = vld [vmem:[#allocation5 + $0x838] sm:$0xff]  ;;  %v108_v32 = vld [vmem:[#allocation3 + $0x88] sm:$0xff] }
  0xee   :  { %1036 = vmatmul.mubr.f32.gmra.mrb[8].mxu0 %v135_v40  ;;  %v489_v40 = vld [vmem:[#allocation5 + $0x770] sm:$0xff]  ;;  %v202_v31 = vld [vmem:[#allocation3 + $0x378] sm:$0xff] }
  0xef   :  { %2311 = vmatpush1.bf16.msra.mxu0 %v2310_v41  ;;  %1041 = vmatprep.mubr.f32.mxu0 %v146_v42  ;;  %v492_v41 = vld [vmem:[#allocation5 + $0x788] sm:$0xff]  ;;  %v494_v42 = vld [vmem:[#allocation5 + $0x798] sm:$0xff]  ;;  %v2338_v46 = vpack.c.bf16 %v489_v40, %v487_v39 }
  0xf0   :  { %2313 = vmatprep.subr.bf16.mxu0 %v2312_v43  ;;  %708 = vmatmul.mubr.f32.gmra.mrb[6].mxu1 %v121_v23  ;;  %v141_v43 = vld [vmem:[#allocation3 + $0x190] sm:$0xff]  ;;  %v2340_v48 = vpack.c.bf16 %v494_v42, %v492_v41  ;;  %v98_v23 = vld [vmem:[#allocation3 + $0x38] sm:$0xff]  ;;  %v1464_v39 = vld [vmem:[#allocation8 + $0x10] sm:$0xff] }
  0xf1   :  { %713 = vmatprep.mubr.f32.mxu1 %v132_v24  ;;  %v1467_v40 = vld [vmem:[#allocation8 + $0x28] sm:$0xff]  ;;  %v1469_v41 = vld [vmem:[#allocation8 + $0x38] sm:$0xff] }
  0xf2   :  { %1042 = vmatmul.mubr.f32.gmra.mrb[10].mxu0 %v145_v49  ;;  %v491_v49 = vld [vmem:[#allocation5 + $0x780] sm:$0xff] }
  0xf3   :  { %2315 = vmatpush1.bf16.msra.mxu0 %v2314_v50  ;;  %1047 = vmatprep.mubr.f32.mxu0 %v156_v51  ;;  %v493_v50 = vld [vmem:[#allocation5 + $0x790] sm:$0xff]  ;;  %v496_v51 = vld [vmem:[#allocation5 + $0x7a8] sm:$0xff] }
  0xf4   :  { %2317 = vmatprep.subr.bf16.mxu0 %v2316_v52  ;;  %714 = vmatmul.mubr.f32.gmra.mrb[8].mxu1 %v131_v33  ;;  %v498_v52 = vld [vmem:[#allocation5 + $0x7b8] sm:$0xff]  ;;  %v2342_v56 = vpack.c.bf16 %v493_v50, %v491_v49  ;;  %v511_v33 = vld [vmem:[#allocation5 + $0x820] sm:$0xff]  ;;  %v201_v49 = vld [vmem:[#allocation3 + $0x370] sm:$0xff]  ;;  %v2408_v50 = vpack.c.bf16 %v1469_v41, %v1467_v40 }
  0xf5   :  { %719 = vmatprep.mubr.f32.mxu1 %v142_v34  ;;  %v2344_v58 = vpack.c.bf16 %v498_v52, %v496_v51  ;;  %v1463_v34 = vld [vmem:[#allocation8 + $0x8] sm:$0xff]  ;;  %v212_v51 = vld [vmem:[#allocation3 + $0x3c8] sm:$0xff] }
  0xf6   :  { %1048 = vmatmul.mubr.f32.gmra.mrb[12].mxu0 %v155_v59  ;;  %v495_v59 = vld [vmem:[#allocation5 + $0x7a0] sm:$0xff]  ;;  %v1485_v40 = vld [vmem:[#allocation8 + $0xb8] sm:$0xff] }
  0xf7   :  { %2319 = vmatpush1.bf16.msra.mxu0 %v2318_v60  ;;  %1053 = vmatprep.mubr.f32.mxu0 %v166_v61  ;;  %v497_v60 = vld [vmem:[#allocation5 + $0x7b0] sm:$0xff]  ;;  %v500_v61 = vld [vmem:[#allocation5 + $0x7c8] sm:$0xff] }
  0xf8   :  { %2321 = vmatprep.subr.bf16.mxu0 %v2320_v62  ;;  %720 = vmatmul.mubr.f32.gmra.mrb[10].mxu1 %v141_v43  ;;  %v502_v62 = vld [vmem:[#allocation5 + $0x7d8] sm:$0xff]  ;;  %v2346_v2 = vpack.c.bf16 %v497_v60, %v495_v59  ;;  %v513_v43 = vld [vmem:[#allocation5 + $0x830] sm:$0xff] }
  0xf9   :  { %725 = vmatprep.mubr.f32.mxu1 %v152_v44  ;;  %v2348_v4 = vpack.c.bf16 %v502_v62, %v500_v61  ;;  %v118_v59 = vld [vmem:[#allocation3 + $0xd8] sm:$0xff]  ;;  %v515_v61 = vld [vmem:[#allocation5 + $0x840] sm:$0xff]  ;;  %v517_v62 = vld [vmem:[#allocation5 + $0x850] sm:$0xff] }
  0xfa   :  { %1054 = vmatmul.mubr.f32.gmra.mrb[14].mxu0 %v165_v5  ;;  %v499_v5 = vld [vmem:[#allocation5 + $0x7c0] sm:$0xff] }
  0xfb   :  { %2323 = vmatpush1.bf16.msra.mxu0 %v2322_v6  ;;  %1059 = vmatprep.mubr.f32.mxu0 %v176_v7  ;;  %v501_v6 = vld [vmem:[#allocation5 + $0x7d0] sm:$0xff]  ;;  %v504_v7 = vld [vmem:[#allocation5 + $0x7e8] sm:$0xff] }
  0xfc   :  { %2325 = vmatprep.subr.bf16.mxu0 %v2324_v8  ;;  %726 = vmatmul.mubr.f32.gmra.mrb[12].mxu1 %v151_v53  ;;  %v506_v8 = vld [vmem:[#allocation5 + $0x7f8] sm:$0xff]  ;;  %v2350_v12 = vpack.c.bf16 %v501_v6, %v499_v5  ;;  %v1477_v6 = vld [vmem:[#allocation8 + $0x78] sm:$0xff] }
  0xfd   :  { %731 = vmatprep.mubr.f32.mxu1 %v162_v54  ;;  %v2352_v14 = vpack.c.bf16 %v506_v8, %v504_v7  ;;  %v1471_v53 = vld [vmem:[#allocation8 + $0x48] sm:$0xff]  ;;  %v1473_v54 = vld [vmem:[#allocation8 + $0x58] sm:$0xff]  ;;  %v2366_v8 = vpack.c.bf16 %v517_v62, %v515_v61 }
  0xfe   :  { %1060 = vmatmul.mubr.f32.gmra.mrb[16].mxu0 %v175_v15  ;;  %v503_v15 = vld [vmem:[#allocation5 + $0x7e0] sm:$0xff]  ;;  %v117_v7 = vld [vmem:[#allocation3 + $0xd0] sm:$0xff]  ;;  %v536_v62 = vld [vmem:[#allocation5 + $0x8e8] sm:$0xff] }
  0xff   :  { %2327 = vmatpush1.bf16.msra.mxu0 %v2326_v16  ;;  %1065 = vmatprep.mubr.f32.mxu0 %v186_v17  ;;  %v505_v16 = vld [vmem:[#allocation5 + $0x7f0] sm:$0xff]  ;;  %v508_v17 = vld [vmem:[#allocation5 + $0x808] sm:$0xff]  ;;  %v1475_v5 = vld [vmem:[#allocation8 + $0x68] sm:$0xff] }
 0x100   :  { %2329 = vmatprep.subr.bf16.mxu0 %v2328_v18  ;;  %732 = vmatmul.mubr.f32.gmra.mrb[14].mxu1 %v161_v63  ;;  %v510_v18 = vld [vmem:[#allocation5 + $0x818] sm:$0xff]  ;;  %v2354_v22 = vpack.c.bf16 %v505_v16, %v503_v15  ;;  %v520_v63 = vld [vmem:[#allocation5 + $0x868] sm:$0xff]  ;;  %v533_v61 = vld [vmem:[#allocation5 + $0x8d0] sm:$0xff] }
 0x101   :  { %737 = vmatprep.mubr.f32.mxu1 %v172_v0  ;;  %v2356_v24 = vpack.c.bf16 %v510_v18, %v508_v17  ;;  %v522_v0 = vld [vmem:[#allocation5 + $0x878] sm:$0xff]  ;;  %v524_v15 = vld [vmem:[#allocation5 + $0x888] sm:$0xff]  ;;  %v221_v17 = vld [vmem:[#allocation3 + $0x410] sm:$0xff]  ;;  %v2416_v18 = vpack.c.bf16 %v1477_v6, %v1475_v5 }
 0x102   :  { %1066 = vmatmul.mubr.f32.gmra.mrb[18].mxu0 %v185_v25  ;;  %v507_v25 = vld [vmem:[#allocation5 + $0x800] sm:$0xff]  ;;  %v526_v16 = vld [vmem:[#allocation5 + $0x898] sm:$0xff]  ;;  %v168_v5 = vld [vmem:[#allocation3 + $0x268] sm:$0xff] }
 0x103   :  { %2331 = vmatpush1.bf16.msra.mxu0 %v2330_v26  ;;  %1071 = vmatprep.mubr.f32.mxu0 %v196_v27  ;;  %v509_v26 = vld [vmem:[#allocation5 + $0x810] sm:$0xff]  ;;  %v512_v27 = vld [vmem:[#allocation5 + $0x828] sm:$0xff] }
 0x104   :  { %2333 = vmatprep.subr.bf16.mxu0 %v2332_v28  ;;  %738 = vmatmul.mubr.f32.gmra.mrb[16].mxu1 %v171_v9  ;;  %v97_v28 = vld [vmem:[#allocation3 + $0x30] sm:$0xff]  ;;  %v2360_v42 = vpack.c.bf16 %v514_v29, %v512_v27  ;;  %v138_v27 = vld [vmem:[#allocation3 + $0x178] sm:$0xff]  ;;  %v523_v29 = vld [vmem:[#allocation5 + $0x880] sm:$0xff] }
 0x105   :  { %743 = vmatprep.mubr.f32.mxu1 %v182_v10  ;;  %v1474_v9 = vld [vmem:[#allocation8 + $0x60] sm:$0xff]  ;;  %v1476_v10 = vld [vmem:[#allocation8 + $0x70] sm:$0xff] }
 0x106   :  { %1072 = vmatmul.mubr.f32.gmra.mrb[20].mxu0 %v195_v35  ;;  %v1465_v35 = vld [vmem:[#allocation8 + $0x18] sm:$0xff] }
 0x107   :  { %2335 = vmatpush1.bf16.msra.mxu0 %v2334_v36  ;;  %1077 = vmatprep.mubr.f32.mxu0 %v206_v37  ;;  %v1462_v36 = vld [vmem:[#allocation8] sm:$0xff]  ;;  %v2358_v37 = vpack.c.bf16 %v509_v26, %v507_v25  ;;  %v1480_v26 = vld [vmem:[#allocation8 + $0x90] sm:$0xff] }
 0x108   :  { %2337 = vmatprep.subr.bf16.mxu0 %v2336_v38  ;;  %744 = vmatmul.mubr.f32.gmra.mrb[18].mxu1 %v181_v19  ;;  %v2404_v38 = vpack.c.bf16 %v1465_v35, %v1463_v34  ;;  %v2406_v44 = vpack.c.bf16 %v1464_v39, %v1462_v36  ;;  %v232_v19 = vld [vmem:[#allocation3 + $0x468] sm:$0xff]  ;;  %v1478_v25 = vld [vmem:[#allocation8 + $0x80] sm:$0xff]  ;;  %v231_v34 = vld [vmem:[#allocation3 + $0x460] sm:$0xff] }
 0x109   :  { %749 = vmatprep.mubr.f32.mxu1 %v192_v20  ;;  %v2418_v20 = vpack.c.bf16 %v1476_v10, %v1474_v9  ;;  %v148_v36 = vld [vmem:[#allocation3 + $0x1c8] sm:$0xff]  ;;  %v1483_v39 = vld [vmem:[#allocation8 + $0xa8] sm:$0xff] }
 0x10a   :  { %1078 = vmatmul.mubr.f32.gmra.mrb[22].mxu0 %v205_v45  ;;  %v1466_v45 = vld [vmem:[#allocation8 + $0x20] sm:$0xff]  ;;  %2405 = vmatprep.subr.bf16.mxu1 %v2404_v38  ;;  %v2422_v38 = vpack.c.bf16 %v1480_v26, %v1478_v25  ;;  %v535_v10 = vld [vmem:[#allocation5 + $0x8e0] sm:$0xff]  ;;  %v544_v26 = vld [vmem:[#allocation5 + $0x928] sm:$0xff] }
 0x10b   :  { %2339 = vmatpush1.bf16.msra.mxu0 %v2338_v46  ;;  %1083 = vmatprep.mubr.f32.mxu0 %v216_v47  ;;  %v1468_v46 = vld [vmem:[#allocation8 + $0x30] sm:$0xff]  ;;  %v541_v25 = vld [vmem:[#allocation5 + $0x910] sm:$0xff] }
 0x10c   :  { %2341 = vmatprep.subr.bf16.mxu0 %v2340_v48  ;;  %750 = vmatmul.mubr.f32.gmra.mrb[20].mxu1 %v191_v30  ;;  %v516_v47 = vld [vmem:[#allocation5 + $0x848] sm:$0xff]  ;;  %v518_v48 = vld [vmem:[#allocation5 + $0x858] sm:$0xff]  ;;  %v2410_v52 = vpack.c.bf16 %v1468_v46, %v1466_v45  ;;  %v525_v30 = vld [vmem:[#allocation5 + $0x890] sm:$0xff] }
 0x10d   :  { %755 = vmatprep.mubr.f32.mxu1 %v202_v31  ;;  %2407 = vmatpush1.bf16.msra.mxu1 %v2406_v44  ;;  %v2364_v60 = vpack.c.bf16 %v518_v48, %v516_v47  ;;  %v137_v31 = vld [vmem:[#allocation3 + $0x170] sm:$0xff]  ;;  %v2374_v41 = vpack.c.bf16 %v525_v30, %v523_v29  ;;  %v1484_v44 = vld [vmem:[#allocation8 + $0xb0] sm:$0xff]  ;;  %v534_v48 = vld [vmem:[#allocation5 + $0x8d8] sm:$0xff] }
 0x10e   :  { %1084 = vmatmul.mubr.f32.gmra.mrb[24].mxu0 %v215_v55  ;;  %v107_v55 = vld [vmem:[#allocation3 + $0x80] sm:$0xff]  ;;  %2409 = vmatprep.subr.bf16.mxu1 %v2408_v50  ;;  %v529_v46 = vld [vmem:[#allocation5 + $0x8b0] sm:$0xff]  ;;  %v532_v47 = vld [vmem:[#allocation5 + $0x8c8] sm:$0xff]  ;;  %v2424_v50 = vpack.c.bf16 %v1485_v40, %v1483_v39 }
 0x10f   :  { %2343 = vmatpush1.bf16.msra.mxu0 %v2342_v56  ;;  %1089 = vmatprep.mubr.f32.mxu0 %v226_v57  ;;  %v2362_v56 = vpack.c.bf16 %v513_v43, %v511_v33  ;;  %v1470_v57 = vld [vmem:[#allocation8 + $0x40] sm:$0xff]  ;;  %v1499_v29 = vld [vmem:[#allocation8 + $0x128] sm:$0xff]  ;;  %v1501_v30 = vld [vmem:[#allocation8 + $0x138] sm:$0xff] }
 0x110   :  { %2345 = vmatprep.subr.bf16.mxu0 %v2344_v58  ;;  %v1472_v58 = vld [vmem:[#allocation8 + $0x50] sm:$0xff]  ;;  %756 = vmatmul.mubr.f32.gmra.mrb[22].mxu1 %v201_v49  ;;  %v530_v33 = vld [vmem:[#allocation5 + $0x8b8] sm:$0xff]  ;;  %v241_v49 = vld [vmem:[#allocation3 + $0x4b0] sm:$0xff] }
 0x111   :  { %761 = vmatprep.mubr.f32.mxu1 %v212_v51  ;;  %2411 = vmatpush1.bf16.msra.mxu1 %v2410_v52  ;;  %v1482_v43 = vld [vmem:[#allocation8 + $0xa0] sm:$0xff]  ;;  %v1487_v51 = vld [vmem:[#allocation8 + $0xc8] sm:$0xff]  ;;  %v1489_v52 = vld [vmem:[#allocation8 + $0xd8] sm:$0xff] }
 0x112   :  { %1090 = vmatmul.mubr.f32.gmra.mrb[26].mxu0 %v225_v1  ;;  %v211_v1 = vld [vmem:[#allocation3 + $0x3c0] sm:$0xff]  ;;  %v545_v39 = vld [vmem:[#allocation5 + $0x930] sm:$0xff]  ;;  %v548_v40 = vld [vmem:[#allocation5 + $0x948] sm:$0xff] }
 0x113   :  { %2347 = vmatpush1.bf16.msra.mxu0 %v2346_v2  ;;  %1095 = vmatprep.mubr.f32.mxu0 %v236_v3  ;;  %v2412_v2 = vpack.c.bf16 %v1473_v54, %v1471_v53  ;;  %v222_v3 = vld [vmem:[#allocation3 + $0x418] sm:$0xff]  ;;  %v147_v53 = vld [vmem:[#allocation3 + $0x1c0] sm:$0xff]  ;;  %v2426_v54 = vpack.c.bf16 %v1484_v44, %v1482_v43  ;;  %v1505_v44 = vld [vmem:[#allocation8 + $0x158] sm:$0xff] }
 0x114   :  { %2349 = vmatprep.subr.bf16.mxu0 %v2348_v4  ;;  %v2414_v4 = vpack.c.bf16 %v1472_v58, %v1470_v57  ;;  %762 = vmatmul.mubr.f32.gmra.mrb[24].mxu1 %v211_v1  ;;  %v1486_v57 = vld [vmem:[#allocation8 + $0xc0] sm:$0xff]  ;;  %v1488_v58 = vld [vmem:[#allocation8 + $0xd0] sm:$0xff]  ;;  %v1491_v1 = vld [vmem:[#allocation8 + $0xe8] sm:$0xff] }
 0x115   :  { %767 = vmatprep.mubr.f32.mxu1 %v222_v3  ;;  %2413 = vmatprep.subr.bf16.mxu1 %v2412_v2  ;;  %v1493_v2 = vld [vmem:[#allocation8 + $0xf8] sm:$0xff]  ;;  %v1503_v43 = vld [vmem:[#allocation8 + $0x148] sm:$0xff] }
 0x116   :  { %1096 = vmatmul.mubr.f32.gmra.mrb[28].mxu0 %v235_v11  ;;  %v128_v11 = vld [vmem:[#allocation3 + $0x128] sm:$0xff]  ;;  %2415 = vmatpush1.bf16.msra.mxu1 %v2414_v4  ;;  %v157_v3 = vld [vmem:[#allocation3 + $0x210] sm:$0xff]  ;;  %v2430_v4 = vpack.c.bf16 %v1488_v58, %v1486_v57  ;;  %v1507_v57 = vld [vmem:[#allocation8 + $0x168] sm:$0xff] }
 0x117   :  { %2351 = vmatpush1.bf16.msra.mxu0 %v2350_v12  ;;  %1101 = vmatprep.mubr.f32.mxu0 %v246_v13  ;;  %v2368_v12 = vpack.c.bf16 %v522_v0, %v520_v63  ;;  %v519_v13 = vld [vmem:[#allocation5 + $0x860] sm:$0xff]  ;;  %v2428_v63 = vpack.c.bf16 %v1489_v52, %v1487_v51  ;;  %v538_v0 = vld [vmem:[#allocation5 + $0x8f8] sm:$0xff]  ;;  %v1509_v58 = vld [vmem:[#allocation8 + $0x178] sm:$0xff] }
 0x118   :  { %2353 = vmatprep.subr.bf16.mxu0 %v2352_v14  ;;  %v521_v14 = vld [vmem:[#allocation5 + $0x870] sm:$0xff]  ;;  %768 = vmatmul.mubr.f32.gmra.mrb[26].mxu1 %v221_v17  ;;  %v2384_v9 = vpack.c.bf16 %v538_v0, %v536_v62  ;;  %v167_v17 = vld [vmem:[#allocation3 + $0x260] sm:$0xff]  ;;  %v208_v0 = vld [vmem:[#allocation3 + $0x3a8] sm:$0xff] }
 0x119   :  { %773 = vmatprep.mubr.f32.mxu1 %v232_v19  ;;  %2417 = vmatprep.subr.bf16.mxu1 %v2416_v18  ;;  %v178_v19 = vld [vmem:[#allocation3 + $0x2b8] sm:$0xff]  ;;  %v547_v52 = vld [vmem:[#allocation5 + $0x940] sm:$0xff] }
 0x11a   :  { %1102 = vmatmul.mubr.f32.gmra.mrb[30].mxu0 %v245_v21  ;;  %v1479_v21 = vld [vmem:[#allocation8 + $0x88] sm:$0xff]  ;;  %2419 = vmatpush1.bf16.msra.mxu1 %v2418_v20  ;;  %v1506_v62 = vld [vmem:[#allocation8 + $0x160] sm:$0xff] }
 0x11b   :  { %2355 = vmatpush1.bf16.msra.mxu0 %v2354_v22  ;;  %1172 = vmatprep.mubr.f32.mxu0 %v98_v23  ;;  %v1481_v22 = vld [vmem:[#allocation8 + $0x98] sm:$0xff]  ;;  %v127_v23 = vld [vmem:[#allocation3 + $0x120] sm:$0xff] }
 0x11c   :  { %2357 = vmatprep.subr.bf16.mxu0 %v2356_v24  ;;  %v2370_v24 = vpack.c.bf16 %v521_v14, %v519_v13  ;;  %v2420_v35 = vpack.c.bf16 %v1481_v22, %v1479_v21  ;;  %774 = vmatmul.mubr.f32.gmra.mrb[28].mxu1 %v231_v34  ;;  %v2432_v13 = vpack.c.bf16 %v1493_v2, %v1491_v1  ;;  %v542_v14 = vld [vmem:[#allocation5 + $0x918] sm:$0xff]  ;;  %v1496_v22 = vld [vmem:[#allocation8 + $0x110] sm:$0xff] }
 0x11d   :  { %v1494_v21 = vld [vmem:[#allocation8 + $0x100] sm:$0xff]  ;;  %v551_v2 = vld [vmem:[#allocation5 + $0x960] sm:$0xff] }
 0x11e   :  { %1173 = vmatmul.mubr.f32.vlgmr.msra.gmra.mrb[0].mxu0 %v97_v28  ;;  %v2372_v28 = vpack.c.bf16 %v526_v16, %v524_v15  ;;  %2421 = vmatprep.subr.bf16.mxu1 %v2420_v35  ;;  %v1495_v15 = vld [vmem:[#allocation8 + $0x108] sm:$0xff]  ;;  %v1497_v16 = vld [vmem:[#allocation8 + $0x118] sm:$0xff]  ;;  %v1498_v35 = vld [vmem:[#allocation8 + $0x120] sm:$0xff] }
 0x11f   :  { %2359 = vmatpush1.bf16.msra.mxu0 %v2358_v37  ;;  %1178 = vmatprep.mubr.f32.mxu0 %v108_v32  ;;  %v528_v32 = vld [vmem:[#allocation5 + $0x8a8] sm:$0xff]  ;;  %v242_v37 = vld [vmem:[#allocation3 + $0x4b8] sm:$0xff] }
 0x120   :  { %2361 = vmatprep.subr.bf16.mxu0 %v2360_v42  ;;  %v527_v42 = vld [vmem:[#allocation5 + $0x8a0] sm:$0xff]  ;;  %v2376_v45 = vpack.c.bf16 %v530_v33, %v528_v32  ;;  %779 = vmatprep.mubr.f32.mxu1 %v242_v37  ;;  %v2438_v32 = vpack.c.bf16 %v1496_v22, %v1494_v21  ;;  %v188_v33 = vld [vmem:[#allocation3 + $0x308] sm:$0xff] }
 0x121   :  { %2423 = vmatpush1.bf16.msra.mxu1 %v2422_v38  ;;  %v543_v38 = vld [vmem:[#allocation5 + $0x920] sm:$0xff] }
 0x122   :  { %1179 = vmatmul.mubr.f32.gmra.mrb[2].mxu0 %v107_v55  ;;  %v158_v55 = vld [vmem:[#allocation3 + $0x218] sm:$0xff]  ;;  %780 = vmatmul.mubr.f32.gmra.mrb[30].mxu1 %v241_v49  ;;  %v1516_v21 = vld [vmem:[#allocation8 + $0x1b0] sm:$0xff] }
 0x123   :  { %2363 = vmatpush1.bf16.msra.mxu0 %v2362_v56  ;;  %1184 = vmatprep.mubr.f32.mxu0 %v118_v59  ;;  %v2378_v56 = vpack.c.bf16 %v529_v46, %v527_v42  ;;  %v2380_v59 = vpack.c.bf16 %v534_v48, %v532_v47  ;;  %v550_v42 = vld [vmem:[#allocation5 + $0x958] sm:$0xff]  ;;  %v2394_v48 = vpack.c.bf16 %v545_v39, %v543_v38  ;;  %v555_v22 = vld [vmem:[#allocation5 + $0x980] sm:$0xf] }
 0x124   :  { %2365 = vmatprep.subr.bf16.mxu0 %v2364_v60  ;;  %v531_v60 = vld [vmem:[#allocation5 + $0x8c0] sm:$0xff]  ;;  %2425 = vmatprep.subr.bf16.mxu1 %v2424_v50  ;;  %v198_v47 = vld [vmem:[#allocation3 + $0x358] sm:$0xff]  ;;  %v2396_v51 = vpack.c.bf16 %v550_v42, %v548_v40  ;;  %v129_v40 = vld [vmem:[#allocation3 + $0x130] sm:$0xff] }
 0x125   :  { %2427 = vmatpush1.bf16.msra.mxu1 %v2426_v54  ;;  %v2382_v6 = vpack.c.bf16 %v533_v61, %v531_v60  ;;  %v1502_v49 = vld [vmem:[#allocation8 + $0x140] sm:$0xff]  ;;  %v1504_v50 = vld [vmem:[#allocation8 + $0x150] sm:$0xff] }
 0x126   :  { %1185 = vmatmul.mubr.f32.gmra.mrb[4].mxu0 %v117_v7  ;;  %v1490_v7 = vld [vmem:[#allocation8 + $0xe0] sm:$0xff]  ;;  %2429 = vmatprep.subr.bf16.mxu1 %v2428_v63  ;;  %v552_v54 = vld [vmem:[#allocation5 + $0x968] sm:$0xff]  ;;  %v119_v38 = vld [vmem:[#allocation3 + $0xe0] sm:$0xff] }
 0x127   :  { %1190 = vmatprep.mubr.f32.mxu0 %v128_v11  ;;  %2367 = vmatpush1.bf16.msra.mxu0 %v2366_v8  ;;  %v1492_v8 = vld [vmem:[#allocation8 + $0xf0] sm:$0xff]  ;;  %v537_v11 = vld [vmem:[#allocation5 + $0x8f0] sm:$0xff]  ;;  %v130_v39 = vld [vmem:[#allocation3 + $0x138] sm:$0xff] }
 0x128   :  { %2369 = vmatprep.subr.bf16.mxu0 %v2368_v12  ;;  %v540_v12 = vld [vmem:[#allocation5 + $0x908] sm:$0xff]  ;;  %v2434_v18 = vpack.c.bf16 %v1492_v8, %v1490_v7  ;;  %v2386_v20 = vpack.c.bf16 %v537_v11, %v535_v10  ;;  %v197_v60 = vld [vmem:[#allocation3 + $0x350] sm:$0xff]  ;;  %v207_v8 = vld [vmem:[#allocation3 + $0x3a0] sm:$0xff] }
 0x129   :  { %2431 = vmatpush1.bf16.msra.mxu1 %v2430_v4  ;;  %v1508_v63 = vld [vmem:[#allocation8 + $0x170] sm:$0xff]  ;;  %v2448_v4 = vpack.c.bf16 %v1509_v58, %v1507_v57  ;;  %v1510_v10 = vld [vmem:[#allocation8 + $0x180] sm:$0xff] }
 0x12a   :  { %1191 = vmatmul.mubr.f32.gmra.mrb[6].mxu0 %v127_v23  ;;  %v2388_v23 = vpack.c.bf16 %v542_v14, %v540_v12  ;;  %2433 = vmatprep.subr.bf16.mxu1 %v2432_v13  ;;  %v2450_v7 = vpack.c.bf16 %v1508_v63, %v1506_v62  ;;  %v1512_v11 = vld [vmem:[#allocation8 + $0x190] sm:$0xff]  ;;  %v218_v12 = vld [vmem:[#allocation3 + $0x3f8] sm:$0xff] }
 0x12b   :  { %1196 = vmatprep.mubr.f32.mxu0 %v138_v27  ;;  %2371 = vmatpush1.bf16.msra.mxu0 %v2370_v24  ;;  %v539_v24 = vld [vmem:[#allocation5 + $0x900] sm:$0xff]  ;;  %v2436_v27 = vpack.c.bf16 %v1497_v16, %v1495_v15  ;;  %v556_v14 = vld [vmem:[#allocation5 + $0x988] sm:$0xf]  ;;  %v250_v63 = vld [vmem:[#allocation3 + $0x4f8] sm:$0xff] }
 0x12c   :  { %2373 = vmatprep.subr.bf16.mxu0 %v2372_v28  ;;  %v546_v28 = vld [vmem:[#allocation5 + $0x938] sm:$0xff]  ;;  %v2390_v34 = vpack.c.bf16 %v541_v25, %v539_v24  ;;  %v1517_v16 = vld [vmem:[#allocation8 + $0x1b8] sm:$0xff]  ;;  %v139_v42 = vld [vmem:[#allocation3 + $0x180] sm:$0xff] }
 0x12d   :  { %2435 = vmatpush1.bf16.msra.mxu1 %v2434_v18  ;;  %v2392_v37 = vpack.c.bf16 %v546_v28, %v544_v26  ;;  %v1515_v15 = vld [vmem:[#allocation8 + $0x1a8] sm:$0xff]  ;;  %v2454_v18 = vpack.c.bf16 %v1512_v11, %v1510_v10  ;;  %v1521_v25 = vld [vmem:[#allocation8 + $0x1d8] sm:$0xff] }
 0x12e   :  { %1197 = vmatmul.mubr.f32.gmra.mrb[8].mxu0 %v137_v31  ;;  %v177_v31 = vld [vmem:[#allocation3 + $0x2b0] sm:$0xff]  ;;  %2437 = vmatprep.subr.bf16.mxu1 %v2436_v27  ;;  %v1519_v24 = vld [vmem:[#allocation8 + $0x1c8] sm:$0xff]  ;;  %v220_v57 = vld [vmem:[#allocation3 + $0x408] sm:$0xff] }
 0x12f   :  { %1202 = vmatprep.mubr.f32.mxu0 %v148_v36  ;;  %2375 = vmatpush1.bf16.msra.mxu0 %v2374_v41  ;;  %v1500_v36 = vld [vmem:[#allocation8 + $0x130] sm:$0xff]  ;;  %v2440_v41 = vpack.c.bf16 %v1501_v30, %v1499_v29  ;;  %v2460_v28 = vpack.c.bf16 %v1521_v25, %v1519_v24  ;;  %v238_v29 = vld [vmem:[#allocation3 + $0x498] sm:$0xff]  ;;  %v237_v30 = vld [vmem:[#allocation3 + $0x490] sm:$0xff] }
 0x130   :  { %2377 = vmatprep.subr.bf16.mxu0 %v2376_v45  ;;  %v187_v45 = vld [vmem:[#allocation3 + $0x300] sm:$0xff]  ;;  %v2442_v46 = vpack.c.bf16 %v1500_v36, %v1498_v35  ;;  %v110_v35 = vld [vmem:[#allocation3 + $0x98] sm:$0xff]  ;;  %v109_v36 = vld [vmem:[#allocation3 + $0x90] sm:$0xff] }
 0x131   :  { %2439 = vmatpush1.bf16.msra.mxu1 %v2438_v32  ;;  %v227_v27 = vld [vmem:[#allocation3 + $0x440] sm:$0xff] }
 0x132   :  { %1203 = vmatmul.mubr.f32.gmra.mrb[10].mxu0 %v147_v53  ;;  %v549_v53 = vld [vmem:[#allocation5 + $0x950] sm:$0xff]  ;;  %2441 = vmatprep.subr.bf16.mxu1 %v2440_v41  ;;  %v247_v32 = vld [vmem:[#allocation3 + $0x4e0] sm:$0xff]  ;;  %v140_v41 = vld [vmem:[#allocation3 + $0x188] sm:$0xff] }
 0x133   :  { %1208 = vmatprep.mubr.f32.mxu0 %v158_v55  ;;  %2379 = vmatpush1.bf16.msra.mxu0 %v2378_v56  ;;  %v2444_v55 = vpack.c.bf16 %v1505_v44, %v1503_v43  ;;  %v554_v56 = vld [vmem:[#allocation5 + $0x978] sm:$0xff]  ;;  %v2398_v61 = vpack.c.bf16 %v549_v53, %v547_v52  ;;  %v149_v44 = vld [vmem:[#allocation3 + $0x1d0] sm:$0xff]  ;;  %v200_v53 = vld [vmem:[#allocation3 + $0x368] sm:$0xff] }
 0x134   :  { %2381 = vmatprep.subr.bf16.mxu0 %v2380_v59  ;;  %v2446_v59 = vpack.c.bf16 %v1504_v50, %v1502_v49  ;;  %v2400_v1 = vpack.c.bf16 %v554_v56, %v552_v54  ;;  %v150_v43 = vld [vmem:[#allocation3 + $0x1d8] sm:$0xff]  ;;  %v180_v49 = vld [vmem:[#allocation3 + $0x2c8] sm:$0xff]  ;;  %v179_v50 = vld [vmem:[#allocation3 + $0x2c0] sm:$0xff] }
 0x135   :  { %2443 = vmatpush1.bf16.msra.mxu1 %v2442_v46  ;;  %v159_v46 = vld [vmem:[#allocation3 + $0x220] sm:$0xff]  ;;  %v189_v52 = vld [vmem:[#allocation3 + $0x310] sm:$0xff] }
 0x136   :  { %1209 = vmatmul.mubr.f32.gmra.mrb[12].mxu0 %v157_v3  ;;  %v553_v3 = vld [vmem:[#allocation5 + $0x970] sm:$0xff]  ;;  %2445 = vmatprep.subr.bf16.mxu1 %v2444_v55  ;;  %v199_v54 = vld [vmem:[#allocation3 + $0x360] sm:$0xff]  ;;  %v210_v55 = vld [vmem:[#allocation3 + $0x3b8] sm:$0xff] }
 0x137   :  { %1214 = vmatprep.mubr.f32.mxu0 %v168_v5  ;;  %2383 = vmatpush1.bf16.msra.mxu0 %v2382_v6  ;;  %v1511_v5 = vld [vmem:[#allocation8 + $0x188] sm:$0xff]  ;;  %v1513_v6 = vld [vmem:[#allocation8 + $0x198] sm:$0xff] }
 0x138   :  { %2385 = vmatprep.subr.bf16.mxu0 %v2384_v9  ;;  %v2402_v9 = vpack.c.bf16 %v553_v3, %v551_v2  ;;  %v2452_v13 = vpack.c.bf16 %v1513_v6, %v1511_v5  ;;  %v209_v56 = vld [vmem:[#allocation3 + $0x3b0] sm:$0xff]  ;;  %v219_v58 = vld [vmem:[#allocation3 + $0x400] sm:$0xff] }
 0x139   :  { %2447 = vmatpush1.bf16.msra.mxu1 %v2446_v59  ;;  %v230_v59 = vld [vmem:[#allocation3 + $0x458] sm:$0xff]  ;;  %v239_v62 = vld [vmem:[#allocation3 + $0x4a0] sm:$0xff]  ;;  %v1525_v5 = vld [vmem:[#allocation8 + $0x1f8] sm:$0xff] }
 0x13a   :  { %1215 = vmatmul.mubr.f32.gmra.mrb[14].mxu0 %v167_v17  ;;  %2449 = vmatprep.subr.bf16.mxu1 %v2448_v4  ;;  %v217_v17 = vld [vmem:[#allocation3 + $0x3f0] sm:$0xff]  ;;  %v1520_v2 = vld [vmem:[#allocation8 + $0x1d0] sm:$0xff]  ;;  %v1523_v4 = vld [vmem:[#allocation8 + $0x1e8] sm:$0xff] }
 0x13b   :  { %1220 = vmatprep.mubr.f32.mxu0 %v178_v19  ;;  %2387 = vmatpush1.bf16.msra.mxu0 %v2386_v20  ;;  %v228_v19 = vld [vmem:[#allocation3 + $0x448] sm:$0xff]  ;;  %v1514_v20 = vld [vmem:[#allocation8 + $0x1a0] sm:$0xff]  ;;  %v2464_v6 = vpack.c.bf16 %v1525_v5, %v1523_v4 }
 0x13c   :  { %2389 = vmatprep.subr.bf16.mxu0 %v2388_v23  ;;  %v2456_v23 = vpack.c.bf16 %v1517_v16, %v1515_v15  ;;  %v2458_v26 = vpack.c.bf16 %v1516_v21, %v1514_v20 }
 0x13d   :  { %2451 = vmatpush1.bf16.msra.mxu1 %v2450_v7  ;;  %v1522_v7 = vld [vmem:[#allocation8 + $0x1e0] sm:$0xff] }
 0x13e   :  { %1221 = vmatmul.mubr.f32.gmra.mrb[16].mxu0 %v177_v31  ;;  %2453 = vmatprep.subr.bf16.mxu1 %v2452_v13  ;;  %v248_v31 = vld [vmem:[#allocation3 + $0x4e8] sm:$0xff] }
 0x13f   :  { %1226 = vmatprep.mubr.f32.mxu0 %v188_v33  ;;  %2391 = vmatpush1.bf16.msra.mxu0 %v2390_v34  ;;  %v100_v33 = vld [vmem:[#allocation3 + $0x48] sm:$0xff]  ;;  %v99_v34 = vld [vmem:[#allocation3 + $0x40] sm:$0xff] }
 0x140   :  { %2393 = vmatprep.subr.bf16.mxu0 %v2392_v37  ;;  %v120_v37 = vld [vmem:[#allocation3 + $0xe8] sm:$0xff] }
 0x141   :  { %2455 = vmatpush1.bf16.msra.mxu1 %v2454_v18 }
 0x142   :  { %1227 = vmatmul.mubr.f32.gmra.mrb[18].mxu0 %v187_v45  ;;  %2457 = vmatprep.subr.bf16.mxu1 %v2456_v23  ;;  %v160_v45 = vld [vmem:[#allocation3 + $0x228] sm:$0xff] }
 0x143   :  { %1232 = vmatprep.mubr.f32.mxu0 %v198_v47  ;;  %2395 = vmatpush1.bf16.msra.mxu0 %v2394_v48  ;;  %v170_v47 = vld [vmem:[#allocation3 + $0x278] sm:$0xff]  ;;  %v169_v48 = vld [vmem:[#allocation3 + $0x270] sm:$0xff] }
 0x144   :  { %2397 = vmatprep.subr.bf16.mxu0 %v2396_v51  ;;  %v190_v51 = vld [vmem:[#allocation3 + $0x318] sm:$0xff] }
 0x145   :  { %2459 = vmatpush1.bf16.msra.mxu1 %v2458_v26 }
 0x146   :  { %1233 = vmatmul.mubr.f32.gmra.mrb[20].mxu0 %v197_v60  ;;  %2461 = vmatprep.subr.bf16.mxu1 %v2460_v28  ;;  %v229_v60 = vld [vmem:[#allocation3 + $0x450] sm:$0xff] }
 0x147   :  { %1238 = vmatprep.mubr.f32.mxu0 %v208_v0  ;;  %2399 = vmatpush1.bf16.msra.mxu0 %v2398_v61  ;;  %v240_v61 = vld [vmem:[#allocation3 + $0x4a8] sm:$0xff]  ;;  %v249_v0 = vld [vmem:[#allocation3 + $0x4f0] sm:$0xff] }
 0x148   :  { %2401 = vmatprep.subr.bf16.mxu0 %v2400_v1  ;;  %v1518_v1 = vld [vmem:[#allocation8 + $0x1c0] sm:$0xff] }
 0x149   :  { %v2462_v3 = vpack.c.bf16 %v1520_v2, %v1518_v1 }
 0x14a   :  { %1239 = vmatmul.mubr.f32.gmra.mrb[22].mxu0 %v207_v8  ;;  %v1524_v8 = vld [vmem:[#allocation8 + $0x1f0] sm:$0xff] }
 0x14b   :  { %1244 = vmatprep.mubr.f32.mxu0 %v218_v12  ;;  %2403 = vmatpush1.bf16.msra.mxu0 %v2402_v9  ;;  %v2466_v9 = vpack.c.bf16 %v1524_v8, %v1522_v7  ;;  %v1733_v8 = vld [vmem:[%s3198_s5 + $0x10] sm:$0xff] }
 0x14c   :  { %2002 = vmatprep.subr.msk.mxu0 %vm618_vm0, %v556_v14  ;;  %2463 = vmatpush1.bf16.msra.mxu1 %v2462_v3 }
 0x14d   :  { %2465 = vmatprep.subr.bf16.mxu1 %v2464_v6 }
 0x14e   :  { %1245 = vmatmul.mubr.f32.gmra.mrb[24].mxu0 %v217_v17 }
 0x14f   :  { %1250 = vmatprep.mubr.f32.mxu0 %v228_v19  ;;  %2003 = vmatpush1.msk.msra.mxu0 %vm618_vm0, %v555_v22 }
 0x150   :  { %2467 = vmatpush1.bf16.msra.mxu1 %v2466_v9  ;;  %v1734_v9 = vld [vmem:[%s3198_s5 + $0x18] sm:$0xff] }
 0x152   :  { %1251 = vmatmul.mubr.f32.gmra.mrb[26].mxu0 %v227_v27 }
 0x153   :  { %1256 = vmatprep.mubr.f32.mxu0 %v238_v29 }
 0x156   :  { %1257 = vmatmul.mubr.f32.gmra.mrb[28].mxu0 %v237_v30 }
 0x157   :  { %1262 = vmatprep.mubr.f32.mxu0 %v248_v31 }
 0x15a   :  { %1263 = vmatmul.mubr.f32.gmra.mrb[30].mxu0 %v247_v32 }
 0x15b   :  { %2004 = vmatprep.mubr.msk.f32.mxu0 %vm569_vm1, %v100_v33 }
 0x15e   :  { %1334 = vmatmul.mubr.f32.vlgmr.msra.gmra.mrb[0].mxu0 %v99_v34  ;;  %v1747_v34 = vld [vmem:[%s3198_s5 + $0x80] sm:$0xff] }
 0x15f   :  { %2005 = vmatprep.mubr.msk.f32.mxu0 %vm569_vm1, %v110_v35  ;;  %v1748_v35 = vld [vmem:[%s3198_s5 + $0x88] sm:$0xff] }
 0x162   :  { %1340 = vmatmul.mubr.f32.gmra.mrb[2].mxu0 %v109_v36  ;;  %v2468_v36 = vpack.c.bf16 %v1748_v35, %v1747_v34  ;;  %v2474_v35 = vpack.c.bf16 %v1734_v9, %v1733_v8 }
 0x163   :  { %2006 = vmatprep.mubr.msk.f32.mxu0 %vm569_vm1, %v120_v37 }
 0x164   :  { %2469 = vmatprep.subr.bf16.mxu1 %v2468_v36 }
 0x166   :  { %1346 = vmatmul.mubr.f32.gmra.mrb[4].mxu0 %v119_v38 }
 0x167   :  { %2007 = vmatprep.mubr.msk.f32.mxu0 %vm569_vm1, %v130_v39 }
 0x16a   :  { %1352 = vmatmul.mubr.f32.gmra.mrb[6].mxu0 %v129_v40 }
 0x16b   :  { %2008 = vmatprep.mubr.msk.f32.mxu0 %vm569_vm1, %v140_v41 }
 0x16e   :  { %1358 = vmatmul.mubr.f32.gmra.mrb[8].mxu0 %v139_v42 }
 0x16f   :  { %2009 = vmatprep.mubr.msk.f32.mxu0 %vm569_vm1, %v150_v43 }
 0x172   :  { %1364 = vmatmul.mubr.f32.gmra.mrb[10].mxu0 %v149_v44 }
 0x173   :  { %2010 = vmatprep.mubr.msk.f32.mxu0 %vm569_vm1, %v160_v45  ;;  %v559_v45 = vlaneseq }
 0x176   :  { %1370 = vmatmul.mubr.f32.gmra.mrb[12].mxu0 %v159_v46  ;;  %v2970_v46 = vshrl.u32 %v559_v45, 7 }
 0x177   :  { %2011 = vmatprep.mubr.msk.f32.mxu0 %vm569_vm1, %v170_v47 }
 0x178   :  { %v561_v47 = vsub.s32 0, %v2970_v46 }
 0x17a   :  { %1376 = vmatmul.mubr.f32.gmra.mrb[14].mxu0 %v169_v48  ;;  %v557_v48 = vld [vmem:[#allocation7] sm:$0x3] }
 0x17b   :  { %2012 = vmatprep.mubr.msk.f32.mxu0 %vm569_vm1, %v180_v49  ;;  %v565_v49 = vsub.s32 1, %v2970_v46 }
 0x17e   :  { %1382 = vmatmul.mubr.f32.gmra.mrb[16].mxu0 %v179_v50  ;;  %v2976_v50 = vrot.slane %v557_v48, %v561_v47 }
 0x17f   :  { %2013 = vmatprep.mubr.msk.f32.mxu0 %vm569_vm1, %v190_v51  ;;  %v2980_v51 = vrot.slane %v557_v48, %v565_v49 }
 0x182   :  { %1388 = vmatmul.mubr.f32.gmra.mrb[18].mxu0 %v189_v52 }
 0x183   :  { %2014 = vmatprep.mubr.msk.f32.mxu0 %vm569_vm1, %v200_v53 }
 0x186   :  { %1394 = vmatmul.mubr.f32.gmra.mrb[20].mxu0 %v199_v54 }
 0x187   :  { %2015 = vmatprep.mubr.msk.f32.mxu0 %vm569_vm1, %v210_v55 }
 0x18a   :  { %1400 = vmatmul.mubr.f32.gmra.mrb[22].mxu0 %v209_v56 }
 0x18b   :  { %2016 = vmatprep.mubr.msk.f32.mxu0 %vm569_vm1, %v220_v57 }
 0x18e   :  { %1406 = vmatmul.mubr.f32.gmra.mrb[24].mxu0 %v219_v58  ;;  %v1731_v58 = vld [vmem:[%s3198_s5] sm:$0xff] }
 0x18f   :  { %2017 = vmatprep.mubr.msk.f32.mxu0 %vm569_vm1, %v230_v59  ;;  %v1732_v59 = vld [vmem:[%s3198_s5 + $0x8] sm:$0xff] }
 0x190   :  { %v2470_v2 = vpack.c.bf16 %v1732_v59, %v1731_v58 }
 0x192   :  { %1412 = vmatmul.mubr.f32.gmra.mrb[26].mxu0 %v229_v60 }
 0x193   :  { %2018 = vmatprep.mubr.msk.f32.mxu0 %vm569_vm1, %v240_v61 }
 0x196   :  { %1418 = vmatmul.mubr.f32.gmra.mrb[28].mxu0 %v239_v62  ;;  %v1749_v62 = vld [vmem:[%s3198_s5 + $0x90] sm:$0xff] }
 0x197   :  { %2019 = vmatprep.mubr.msk.f32.mxu0 %vm569_vm1, %v250_v63  ;;  %v1750_v63 = vld [vmem:[%s3198_s5 + $0x98] sm:$0xff] }
 0x198   :  { %v2472_v7 = vpack.c.bf16 %v1750_v63, %v1749_v62 }
 0x19a   :  { %1424 = vmatmul.mubr.f32.gmra.mrb[30].mxu0 %v249_v0 }
 0x1b7   :  { %v691_v10 = vpop.f32.mrb[0].mxu1 }
 0x1b8   :  { %v693_v11 = vpop.f32.mrb[1].mxu1  ;;  %v692_v52 = vadd.f32 %v691_v10, %v2976_v50 }
 0x1b9   :  { %v694_v53 = vadd.f32 %v693_v11, %v2980_v51 }
 0x1bb   :  { %v697_v12 = vpop.f32.mrb[2].mxu1 }
 0x1bc   :  { %v699_v13 = vpop.f32.mrb[3].mxu1  ;;  %v698_v57 = vadd.f32 %v697_v12, %v2976_v50  ;;  %v1751_v12 = vld [vmem:[%s3198_s5 + $0xa0] sm:$0xff] }
 0x1bd   :  { %v700_v61 = vadd.f32 %v699_v13, %v2980_v51  ;;  %v1752_v13 = vld [vmem:[%s3198_s5 + $0xa8] sm:$0xff] }
 0x1bf   :  { %v703_v14 = vpop.f32.mrb[4].mxu1 }
 0x1c0   :  { %v705_v15 = vpop.f32.mrb[5].mxu1  ;;  %v704_v6 = vadd.f32 %v703_v14, %v2976_v50 }
 0x1c1   :  { %v706_v11 = vadd.f32 %v705_v15, %v2980_v51  ;;  %v2476_v15 = vpack.c.bf16 %v1752_v13, %v1751_v12  ;;  %v1739_v13 = vld [vmem:[%s3198_s5 + $0x40] sm:$0xff] }
 0x1c3   :  { %v2912_v16 = vpop.f32.mrb[6].mxu1 }
 0x1c4   :  { %v2914_v17 = vpop.f32.mrb[7].mxu1 }
 0x1c7   :  { %v2916_v18 = vpop.f32.mrb[8].mxu1 }
 0x1c8   :  { %v2918_v19 = vpop.f32.mrb[9].mxu1 }
 0x1cb   :  { %v2920_v20 = vpop.f32.mrb[10].mxu1 }
 0x1cc   :  { %v2922_v21 = vpop.f32.mrb[11].mxu1  ;;  %v722_v12 = vadd.f32 %v2920_v20, %v2976_v50  ;;  %v1758_v20 = vld [vmem:[%s3198_s5 + $0xd8] sm:$0xff] }
 0x1cf   :  { %v2924_v22 = vpop.f32.mrb[12].mxu1 }
 0x1d0   :  { %v2926_v23 = vpop.f32.mrb[13].mxu1 }
 0x1d3   :  { %v2928_v24 = vpop.f32.mrb[14].mxu1 }
 0x1d4   :  { %v2930_v25 = vpop.f32.mrb[15].mxu1 }
 0x1d7   :  { %v2932_v26 = vpop.f32.mrb[16].mxu1 }
 0x1d8   :  { %v2934_v27 = vpop.f32.mrb[17].mxu1 }
 0x1db   :  { %v2936_v28 = vpop.f32.mrb[18].mxu1 }
 0x1dc   :  { %v2938_v29 = vpop.f32.mrb[19].mxu1 }
 0x1df   :  { %v2940_v30 = vpop.f32.mrb[20].mxu1 }
 0x1e0   :  { %v2942_v31 = vpop.f32.mrb[21].mxu1 }
 0x1e3   :  { %v2944_v32 = vpop.f32.mrb[22].mxu1 }
 0x1e4   :  { %v2946_v33 = vpop.f32.mrb[23].mxu1 }
 0x1e7   :  { %v2954_v37 = vpop.f32.mrb[24].mxu1 }
 0x1e8   :  { %v2956_v38 = vpop.f32.mrb[25].mxu1 }
 0x1eb   :  { %v2958_v39 = vpop.f32.mrb[26].mxu1 }
 0x1ec   :  { %v2960_v40 = vpop.f32.mrb[27].mxu1 }
 0x1ef   :  { %v2962_v41 = vpop.f32.mrb[28].mxu1 }
 0x1f0   :  { %v2964_v42 = vpop.f32.mrb[29].mxu1 }
 0x1f5   :  { %v2966_v43 = vpop.f32.mrb[30].mxu1 }
 0x1f6   :  { %v2968_v44 = vpop.f32.mrb[31].mxu1 }
 0x231   :  { %v1335_v54 = vpop.f32.mrb[0].mxu0 }
 0x232   :  { %v2501_v55 = vadd.f32 %v1335_v54, %v692_v52  ;;  %v1337_v56 = vpop.f32.mrb[1].mxu0  ;;  %v710_v52 = vadd.f32 %v2912_v16, %v2976_v50  ;;  %v1736_v54 = vld [vmem:[%s3198_s5 + $0x28] sm:$0xff]  ;;  %v1754_v16 = vld [vmem:[%s3198_s5 + $0xb8] sm:$0xff] }
 0x233   :  { %v2503_v60 = vadd.f32 %v1337_v56, %v694_v53  ;;  %v1735_v53 = vld [vmem:[%s3198_s5 + $0x20] sm:$0xff]  ;;  %v712_v56 = vadd.f32 %v2914_v17, %v2980_v51 }
 0x234   :  { %v1430_v3 = vmax.f32 %v2501_v55, 0.0 }
 0x235   :  { %v1431_v0 = vmax.f32 %v2503_v60, 0.0  ;;  %v1341_v1 = vpop.f32.mrb[2].mxu0  ;;  %v2478_v60 = vpack.c.bf16 %v1736_v54, %v1735_v53 }
 0x236   :  { %v2505_v4 = vadd.f32 %v1341_v1, %v698_v57  ;;  %v1343_v5 = vpop.f32.mrb[3].mxu0  ;;  %v1753_v57 = vld [vmem:[%s3198_s5 + $0xb0] sm:$0xff] }
 0x237   :  { %v2507_v10 = vadd.f32 %v1343_v5, %v700_v61  ;;  %1602 = vmatprep.mubr.f32.mxu1 %v1431_v0  ;;  %v716_v0 = vadd.f32 %v2916_v18, %v2976_v50  ;;  %v2480_v17 = vpack.c.bf16 %v1754_v16, %v1753_v57  ;;  %v1737_v1 = vld [vmem:[%s3198_s5 + $0x30] sm:$0xff]  ;;  %v1755_v5 = vld [vmem:[%s3198_s5 + $0xc0] sm:$0xff]  ;;  %v1756_v18 = vld [vmem:[%s3198_s5 + $0xc8] sm:$0xff] }
 0x238   :  { %1603 = vmatmul.mubr.f32.vlgmr.msra.gmra.mrb[32].mxu1 %v1430_v3  ;;  %v1432_v36 = vmax.f32 %v2505_v4, 0.0  ;;  %v718_v4 = vadd.f32 %v2918_v19, %v2980_v51  ;;  %v2484_v19 = vpack.c.bf16 %v1756_v18, %v1755_v5  ;;  %v1742_v57 = vld [vmem:[%s3198_s5 + $0x58] sm:$0xff]  ;;  %v736_v5 = vadd.f32 %v2930_v25, %v2980_v51  ;;  %v1761_v18 = vld [vmem:[%s3198_s5 + $0xf0] sm:$0xff] }
 0x239   :  { %v1433_v14 = vmax.f32 %v2507_v10, 0.0  ;;  %v1347_v34 = vpop.f32.mrb[4].mxu0  ;;  %2471 = vmatpush3.bf16.msra.mxu1 %v2470_v2  ;;  %v1738_v2 = vld [vmem:[%s3198_s5 + $0x38] sm:$0xff] }
 0x23a   :  { %v2509_v45 = vadd.f32 %v1347_v34, %v704_v6  ;;  %v1349_v48 = vpop.f32.mrb[5].mxu0  ;;  %2473 = vmatprep.subr.bf16.mxu1 %v2472_v7  ;;  %v2482_v8 = vpack.c.bf16 %v1738_v2, %v1737_v1  ;;  %v734_v1 = vadd.f32 %v2928_v24, %v2976_v50  ;;  %v1743_v2 = vld [vmem:[%s3198_s5 + $0x60] sm:$0xff]  ;;  %v1762_v24 = vld [vmem:[%s3198_s5 + $0xf8] sm:$0xff] }
 0x23b   :  { %v2511_v55 = vadd.f32 %v1349_v48, %v706_v11  ;;  %1608 = vmatprep.mubr.f32.mxu1 %v1433_v14  ;;  %v1740_v14 = vld [vmem:[%s3198_s5 + $0x48] sm:$0xff]  ;;  %v2496_v25 = vpack.c.bf16 %v1762_v24, %v1761_v18  ;;  %v772_v18 = vadd.f32 %v2960_v40, %v2980_v51 }
 0x23c   :  { %1609 = vmatmul.mubr.f32.gmra.mrb[34].mxu1 %v1432_v36  ;;  %v1434_v61 = vmax.f32 %v2509_v45, 0.0  ;;  %v1757_v36 = vld [vmem:[%s3198_s5 + $0xd0] sm:$0xff] }
 0x23d   :  { %v1435_v58 = vmax.f32 %v2511_v55, 0.0  ;;  %v1353_v59 = vpop.f32.mrb[6].mxu0  ;;  %2475 = vmatpush3.bf16.msra.mxu1 %v2474_v35  ;;  %v724_v35 = vadd.f32 %v2922_v21, %v2980_v51  ;;  %v728_v55 = vadd.f32 %v2924_v22, %v2976_v50  ;;  %v2488_v21 = vpack.c.bf16 %v1758_v20, %v1757_v36  ;;  %v1760_v22 = vld [vmem:[%s3198_s5 + $0xe8] sm:$0xff] }
 0x23e   :  { %v2513_v62 = vadd.f32 %v1353_v59, %v710_v52  ;;  %v1355_v63 = vpop.f32.mrb[7].mxu0  ;;  %2477 = vmatprep.subr.bf16.mxu1 %v2476_v15  ;;  %v2486_v52 = vpack.c.bf16 %v1740_v14, %v1739_v13  ;;  %v1759_v59 = vld [vmem:[%s3198_s5 + $0xe0] sm:$0xff]  ;;  %v742_v13 = vadd.f32 %v2934_v27, %v2980_v51 }
 0x23f   :  { %v2515_v3 = vadd.f32 %v1355_v63, %v712_v56  ;;  %1614 = vmatprep.mubr.f32.mxu1 %v1435_v58  ;;  %v1741_v56 = vld [vmem:[%s3198_s5 + $0x50] sm:$0xff]  ;;  %v730_v58 = vadd.f32 %v2926_v23, %v2980_v51  ;;  %v2492_v23 = vpack.c.bf16 %v1760_v22, %v1759_v59  ;;  %v758_v59 = vadd.f32 %v2944_v32, %v2976_v50 }
 0x240   :  { %1615 = vmatmul.mubr.f32.gmra.mrb[36].mxu1 %v1434_v61  ;;  %v1436_v9 = vmax.f32 %v2513_v62, 0.0  ;;  %v2490_v62 = vpack.c.bf16 %v1742_v57, %v1741_v56 }
 0x241   :  { %v1437_v6 = vmax.f32 %v2515_v3, 0.0  ;;  %v1359_v7 = vpop.f32.mrb[8].mxu0  ;;  %2479 = vmatpush3.bf16.msra.mxu1 %v2478_v60  ;;  %v1744_v3 = vld [vmem:[%s3198_s5 + $0x68] sm:$0xff] }
 0x242   :  { %v2517_v10 = vadd.f32 %v1359_v7, %v716_v0  ;;  %v1361_v11 = vpop.f32.mrb[9].mxu0  ;;  %2481 = vmatprep.subr.bf16.mxu1 %v2480_v17 }
 0x243   :  { %v2519_v34 = vadd.f32 %v1361_v11, %v718_v4  ;;  %1620 = vmatprep.mubr.f32.mxu1 %v1437_v6 }
 0x244   :  { %1621 = vmatmul.mubr.f32.gmra.mrb[38].mxu1 %v1436_v9  ;;  %v1438_v15 = vmax.f32 %v2517_v10, 0.0 }
 0x245   :  { %v1439_v45 = vmax.f32 %v2519_v34, 0.0  ;;  %v1365_v48 = vpop.f32.mrb[10].mxu0  ;;  %2483 = vmatpush3.bf16.msra.mxu1 %v2482_v8  ;;  %v2494_v8 = vpack.c.bf16 %v1744_v3, %v1743_v2 }
 0x246   :  { %v2521_v53 = vadd.f32 %v1365_v48, %v722_v12  ;;  %v1367_v54 = vpop.f32.mrb[11].mxu0  ;;  %2485 = vmatprep.subr.bf16.mxu1 %v2484_v19  ;;  %v740_v12 = vadd.f32 %v2932_v26, %v2976_v50  ;;  %v748_v26 = vadd.f32 %v2938_v29, %v2980_v51 }
 0x247   :  { %v2523_v16 = vadd.f32 %v1367_v54, %v724_v35  ;;  %1626 = vmatprep.mubr.f32.mxu1 %v1439_v45  ;;  %v746_v45 = vadd.f32 %v2936_v28, %v2976_v50  ;;  %v754_v28 = vadd.f32 %v2942_v31, %v2980_v51 }
 0x248   :  { %1627 = vmatmul.mubr.f32.gmra.mrb[40].mxu1 %v1438_v15  ;;  %v1440_v63 = vmax.f32 %v2521_v53, 0.0 }
 0x249   :  { %v1441_v60 = vmax.f32 %v2523_v16, 0.0  ;;  %v1371_v61 = vpop.f32.mrb[12].mxu0  ;;  %2487 = vmatpush3.bf16.msra.mxu1 %v2486_v52 }
 0x24a   :  { %v2525_v0 = vadd.f32 %v1371_v61, %v728_v55  ;;  %v1373_v17 = vpop.f32.mrb[13].mxu0  ;;  %2489 = vmatprep.subr.bf16.mxu1 %v2488_v21  ;;  %v752_v55 = vadd.f32 %v2940_v30, %v2976_v50 }
 0x24b   :  { %v2527_v4 = vadd.f32 %v1373_v17, %v730_v58  ;;  %1632 = vmatprep.mubr.f32.mxu1 %v1441_v60  ;;  %v760_v60 = vadd.f32 %v2946_v33, %v2980_v51 }
 0x24c   :  { %1633 = vmatmul.mubr.f32.gmra.mrb[42].mxu1 %v1440_v63  ;;  %v1442_v9 = vmax.f32 %v2525_v0, 0.0  ;;  %v764_v0 = vadd.f32 %v2954_v37, %v2976_v50 }
 0x24d   :  { %v1443_v6 = vmax.f32 %v2527_v4, 0.0  ;;  %v1377_v7 = vpop.f32.mrb[14].mxu0  ;;  %2491 = vmatpush3.bf16.msra.mxu1 %v2490_v62  ;;  %v770_v4 = vadd.f32 %v2958_v39, %v2976_v50 }
 0x24e   :  { %v2529_v10 = vadd.f32 %v1377_v7, %v734_v1  ;;  %v1379_v11 = vpop.f32.mrb[15].mxu0  ;;  %2493 = vmatprep.subr.bf16.mxu1 %v2492_v23  ;;  %v766_v1 = vadd.f32 %v2956_v38, %v2980_v51 }
 0x24f   :  { %v2531_v19 = vadd.f32 %v1379_v11, %v736_v5  ;;  %1638 = vmatprep.mubr.f32.mxu1 %v1443_v6 }
 0x250   :  { %1639 = vmatmul.mubr.f32.gmra.mrb[44].mxu1 %v1442_v9  ;;  %v1444_v35 = vmax.f32 %v2529_v10, 0.0  ;;  %v778_v10 = vadd.f32 %v2964_v42, %v2980_v51 }
 0x251   :  { %v1445_v14 = vmax.f32 %v2531_v19, 0.0  ;;  %v1383_v34 = vpop.f32.mrb[16].mxu0  ;;  %2495 = vmatpush3.bf16.msra.mxu1 %v2494_v8  ;;  %v776_v8 = vadd.f32 %v2962_v41, %v2976_v50  ;;  %v782_v19 = vadd.f32 %v2966_v43, %v2976_v50  ;;  %v1745_v43 = vld [vmem:[%s3198_s5 + $0x70] sm:$0xff] }
 0x252   :  { %v2533_v36 = vadd.f32 %v1383_v34, %v740_v12  ;;  %v1385_v20 = vpop.f32.mrb[17].mxu0  ;;  %2497 = vmatprep.subr.bf16.mxu1 %v2496_v25 }
 0x253   :  { %v2535_v48 = vadd.f32 %v1385_v20, %v742_v13  ;;  %1644 = vmatprep.mubr.f32.mxu1 %v1445_v14  ;;  %v784_v14 = vadd.f32 %v2968_v44, %v2980_v51  ;;  %v1746_v44 = vld [vmem:[%s3198_s5 + $0x78] sm:$0xff]  ;;  %v1526_v51 = vld [vmem:[#allocation10] sm:$0x3] }
 0x254   :  { %1645 = vmatmul.mubr.f32.gmra.mrb[46].mxu1 %v1444_v35  ;;  %v1446_v27 = vmax.f32 %v2533_v36, 0.0  ;;  %v2498_v50 = vpack.c.bf16 %v1746_v44, %v1745_v43 }
 0x255   :  { %v1447_v52 = vmax.f32 %v2535_v48, 0.0  ;;  %v1389_v15 = vpop.f32.mrb[18].mxu0 }
 0x256   :  { %v2537_v53 = vadd.f32 %v1389_v15, %v746_v45  ;;  %v1391_v54 = vpop.f32.mrb[19].mxu0  ;;  %2499 = vmatpush3.bf16.msra.mxu1 %v2498_v50 }
 0x257   :  { %v2539_v21 = vadd.f32 %v1391_v54, %v748_v26  ;;  %1650 = vmatprep.mubr.f32.mxu1 %v1447_v52  ;;  %v3132_v26 = vrot.slane %v1526_v51, %v561_v47  ;;  %v3136_v52 = vrot.slane %v1526_v51, %v565_v49 }
 0x258   :  { %1651 = vmatmul.mubr.f32.gmra.mrb[48].mxu1 %v1446_v27  ;;  %v1448_v16 = vmax.f32 %v2537_v53, 0.0 }
 0x259   :  { %v1449_v56 = vmax.f32 %v2539_v21, 0.0  ;;  %v1395_v57 = vpop.f32.mrb[20].mxu0 }
 0x25a   :  { %v2541_v58 = vadd.f32 %v1395_v57, %v752_v55  ;;  %v1397_v29 = vpop.f32.mrb[21].mxu0 }
 0x25b   :  { %v2543_v22 = vadd.f32 %v1397_v29, %v754_v28  ;;  %1656 = vmatprep.mubr.f32.mxu1 %v1449_v56 }
 0x25c   :  { %1657 = vmatmul.mubr.f32.gmra.mrb[50].mxu1 %v1448_v16  ;;  %v1450_v62 = vmax.f32 %v2541_v58, 0.0 }
 0x25d   :  { %v1451_v30 = vmax.f32 %v2543_v22, 0.0  ;;  %v1401_v61 = vpop.f32.mrb[22].mxu0 }
 0x25e   :  { %v2545_v63 = vadd.f32 %v1401_v61, %v758_v59  ;;  %v1403_v31 = vpop.f32.mrb[23].mxu0 }
 0x25f   :  { %v2547_v17 = vadd.f32 %v1403_v31, %v760_v60  ;;  %1662 = vmatprep.mubr.f32.mxu1 %v1451_v30 }
 0x260   :  { %1663 = vmatmul.mubr.f32.gmra.mrb[52].mxu1 %v1450_v62  ;;  %v1452_v2 = vmax.f32 %v2545_v63, 0.0 }
 0x261   :  { %v1453_v32 = vmax.f32 %v2547_v17, 0.0  ;;  %v1407_v23 = vpop.f32.mrb[24].mxu0 }
 0x262   :  { %v2549_v3 = vadd.f32 %v1407_v23, %v764_v0  ;;  %v1409_v33 = vpop.f32.mrb[25].mxu0 }
 0x263   :  { %v2551_v5 = vadd.f32 %v1409_v33, %v766_v1  ;;  %1668 = vmatprep.mubr.f32.mxu1 %v1453_v32 }
 0x264   :  { %1669 = vmatmul.mubr.f32.gmra.mrb[54].mxu1 %v1452_v2  ;;  %v1454_v6 = vmax.f32 %v2549_v3, 0.0 }
 0x265   :  { %v1455_v37 = vmax.f32 %v2551_v5, 0.0  ;;  %v1413_v24 = vpop.f32.mrb[26].mxu0 }
 0x266   :  { %v2553_v7 = vadd.f32 %v1413_v24, %v770_v4  ;;  %v1415_v38 = vpop.f32.mrb[27].mxu0 }
 0x267   :  { %v2555_v9 = vadd.f32 %v1415_v38, %v772_v18  ;;  %1674 = vmatprep.mubr.f32.mxu1 %v1455_v37 }
 0x268   :  { %1675 = vmatmul.mubr.f32.gmra.mrb[56].mxu1 %v1454_v6  ;;  %v1456_v12 = vmax.f32 %v2553_v7, 0.0 }
 0x269   :  { %v1457_v39 = vmax.f32 %v2555_v9, 0.0  ;;  %v1419_v11 = vpop.f32.mrb[28].mxu0 }
 0x26a   :  { %v2557_v25 = vadd.f32 %v1419_v11, %v776_v8  ;;  %v1421_v40 = vpop.f32.mrb[29].mxu0 }
 0x26b   :  { %v2559_v13 = vadd.f32 %v1421_v40, %v778_v10  ;;  %1680 = vmatprep.mubr.f32.mxu1 %v1457_v39 }
 0x26c   :  { %1681 = vmatmul.mubr.f32.gmra.mrb[58].mxu1 %v1456_v12  ;;  %v1458_v35 = vmax.f32 %v2557_v25, 0.0 }
 0x26d   :  { %v1459_v41 = vmax.f32 %v2559_v13, 0.0  ;;  %v1425_v34 = vpop.f32.mrb[30].mxu0 }
 0x26e   :  { %v2561_v36 = vadd.f32 %v1425_v34, %v782_v19  ;;  %v1427_v42 = vpop.f32.mrb[31].mxu0 }
 0x26f   :  { %v2563_v20 = vadd.f32 %v1427_v42, %v784_v14  ;;  %1686 = vmatprep.mubr.f32.mxu1 %v1459_v41 }
 0x270   :  { %1687 = vmatmul.mubr.f32.gmra.mrb[60].mxu1 %v1458_v35  ;;  %v1460_v48 = vmax.f32 %v2561_v36, 0.0 }
 0x271   :  { %v1461_v45 = vmax.f32 %v2563_v20, 0.0 }
 0x273   :  { %1692 = vmatprep.mubr.f32.mxu1 %v1461_v45 }
 0x274   :  { %1693 = vmatmul.mubr.f32.gmra.mrb[62].mxu1 %v1460_v48 }
 0x30b   :  { %v1604_v15 = vpop.f32.mrb[32].mxu1 }
 0x30c   :  { %v1605_v27 = vadd.f32 %v1604_v15, %v3132_v26  ;;  %v1606_v53 = vpop.f32.mrb[33].mxu1 }
 0x30d   :  { %v1607_v54 = vadd.f32 %v1606_v53, %v3136_v52 }
 0x30e   :  { %v1699_v28 = vmax.f32 %v1605_v27, 0.0 }
 0x30f   :  { %v1700_v55 = vmax.f32 %v1607_v54, 0.0  ;;  %v1610_v21 = vpop.f32.mrb[34].mxu1 }
 0x310   :  { %v1611_v56 = vadd.f32 %v1610_v21, %v3132_v26  ;;  %v1612_v57 = vpop.f32.mrb[35].mxu1 }
 0x311   :  { %v1613_v16 = vadd.f32 %v1612_v57, %v3136_v52  ;;  %1829 = vmatprep.mubr.f32.mxu1 %v1700_v55 }
 0x312   :  { %1830 = vmatmul.mubr.f32.vlgmr.msra.gmra.mrb[64].mxu1 %v1699_v28  ;;  %v1701_v49 = vmax.f32 %v1611_v56, 0.0 }
 0x313   :  { %v1702_v47 = vmax.f32 %v1613_v16, 0.0  ;;  %v1616_v46 = vpop.f32.mrb[36].mxu1 }
 0x314   :  { %v1617_v58 = vadd.f32 %v1616_v46, %v3132_v26  ;;  %v1618_v29 = vpop.f32.mrb[37].mxu1 }
 0x315   :  { %v1619_v59 = vadd.f32 %v1618_v29, %v3136_v52  ;;  %1834 = vmatprep.mubr.f32.mxu1 %v1702_v47 }
 0x316   :  { %1835 = vmatmul.mubr.f32.gmra.mrb[66].mxu1 %v1701_v49  ;;  %v1703_v30 = vmax.f32 %v1617_v58, 0.0 }
 0x317   :  { %v1704_v22 = vmax.f32 %v1619_v59, 0.0  ;;  %v1622_v60 = vpop.f32.mrb[38].mxu1 }
 0x318   :  { %v1623_v61 = vadd.f32 %v1622_v60, %v3132_v26  ;;  %v1624_v62 = vpop.f32.mrb[39].mxu1 }
 0x319   :  { %v1625_v63 = vadd.f32 %v1624_v62, %v3136_v52  ;;  %1839 = vmatprep.mubr.f32.mxu1 %v1704_v22 }
 0x31a   :  { %1840 = vmatmul.mubr.f32.gmra.mrb[68].mxu1 %v1703_v30  ;;  %v1705_v17 = vmax.f32 %v1623_v61, 0.0 }
 0x31b   :  { %v1706_v31 = vmax.f32 %v1625_v63, 0.0  ;;  %v1628_v0 = vpop.f32.mrb[40].mxu1 }
 0x31c   :  { %v1629_v1 = vadd.f32 %v1628_v0, %v3132_v26  ;;  %v1630_v32 = vpop.f32.mrb[41].mxu1 }
 0x31d   :  { %v1631_v23 = vadd.f32 %v1630_v32, %v3136_v52  ;;  %1844 = vmatprep.mubr.f32.mxu1 %v1706_v31 }
 0x31e   :  { %1845 = vmatmul.mubr.f32.gmra.mrb[70].mxu1 %v1705_v17  ;;  %v1707_v33 = vmax.f32 %v1629_v1, 0.0 }
 0x31f   :  { %v1708_v2 = vmax.f32 %v1631_v23, 0.0  ;;  %v1634_v3 = vpop.f32.mrb[42].mxu1 }
 0x320   :  { %v1635_v4 = vadd.f32 %v1634_v3, %v3132_v26  ;;  %v1636_v5 = vpop.f32.mrb[43].mxu1 }
 0x321   :  { %v1637_v18 = vadd.f32 %v1636_v5, %v3136_v52  ;;  %1849 = vmatprep.mubr.f32.mxu1 %v1708_v2 }
 0x322   :  { %1850 = vmatmul.mubr.f32.gmra.mrb[72].mxu1 %v1707_v33  ;;  %v1709_v6 = vmax.f32 %v1635_v4, 0.0 }
 0x323   :  { %v1710_v37 = vmax.f32 %v1637_v18, 0.0  ;;  %v1640_v24 = vpop.f32.mrb[44].mxu1 }
 0x324   :  { %v1641_v7 = vadd.f32 %v1640_v24, %v3132_v26  ;;  %v1642_v38 = vpop.f32.mrb[45].mxu1  ;;  %v1764_v24 = vstv %s3199_s6 }
 0x325   :  { %v1643_v8 = vadd.f32 %v1642_v38, %v3136_v52  ;;  %1854 = vmatprep.mubr.f32.mxu1 %v1710_v37 }
 0x326   :  { %1855 = vmatmul.mubr.f32.gmra.mrb[74].mxu1 %v1709_v6  ;;  %v1711_v39 = vmax.f32 %v1641_v7, 0.0 }
 0x327   :  { %v1712_v9 = vmax.f32 %v1643_v8, 0.0  ;;  %v1646_v10 = vpop.f32.mrb[46].mxu1 }
 0x328   :  { %v1647_v11 = vadd.f32 %v1646_v10, %v3132_v26  ;;  %v1648_v12 = vpop.f32.mrb[47].mxu1 }
 0x329   :  { %v1649_v25 = vadd.f32 %v1648_v12, %v3136_v52  ;;  %1859 = vmatprep.mubr.f32.mxu1 %v1712_v9 }
 0x32a   :  { %1860 = vmatmul.mubr.f32.gmra.mrb[76].mxu1 %v1711_v39  ;;  %v1713_v13 = vmax.f32 %v1647_v11, 0.0 }
 0x32b   :  { %v1714_v40 = vmax.f32 %v1649_v25, 0.0  ;;  %v1652_v19 = vpop.f32.mrb[48].mxu1 }
 0x32c   :  { %v1653_v14 = vadd.f32 %v1652_v19, %v3132_v26  ;;  %v1654_v41 = vpop.f32.mrb[49].mxu1 }
 0x32d   :  { %v1655_v34 = vadd.f32 %v1654_v41, %v3136_v52  ;;  %1864 = vmatprep.mubr.f32.mxu1 %v1714_v40 }
 0x32e   :  { %1865 = vmatmul.mubr.f32.gmra.mrb[78].mxu1 %v1713_v13  ;;  %v1715_v42 = vmax.f32 %v1653_v14, 0.0 }
 0x32f   :  { %v1716_v35 = vmax.f32 %v1655_v34, 0.0  ;;  %v1658_v36 = vpop.f32.mrb[50].mxu1 }
 0x330   :  { %v1659_v20 = vadd.f32 %v1658_v36, %v3132_v26  ;;  %v1660_v45 = vpop.f32.mrb[51].mxu1 }
 0x331   :  { %v1661_v48 = vadd.f32 %v1660_v45, %v3136_v52  ;;  %1869 = vmatprep.mubr.f32.mxu1 %v1716_v35 }
 0x332   :  { %1870 = vmatmul.mubr.f32.gmra.mrb[80].mxu1 %v1715_v42  ;;  %v1717_v50 = vmax.f32 %v1659_v20, 0.0 }
 0x333   :  { %v1718_v43 = vmax.f32 %v1661_v48, 0.0  ;;  %v1664_v44 = vpop.f32.mrb[52].mxu1 }
 0x334   :  { %v1665_v51 = vadd.f32 %v1664_v44, %v3132_v26  ;;  %v1666_v15 = vpop.f32.mrb[53].mxu1 }
 0x335   :  { %v1667_v27 = vadd.f32 %v1666_v15, %v3136_v52  ;;  %1874 = vmatprep.mubr.f32.mxu1 %v1718_v43 }
 0x336   :  { %1875 = vmatmul.mubr.f32.gmra.mrb[82].mxu1 %v1717_v50  ;;  %v1719_v55 = vmax.f32 %v1665_v51, 0.0 }
 0x337   :  { %v1720_v53 = vmax.f32 %v1667_v27, 0.0  ;;  %v1670_v54 = vpop.f32.mrb[54].mxu1 }
 0x338   :  { %v1671_v21 = vadd.f32 %v1670_v54, %v3132_v26  ;;  %v1672_v28 = vpop.f32.mrb[55].mxu1 }
 0x339   :  { %v1673_v56 = vadd.f32 %v1672_v28, %v3136_v52  ;;  %1879 = vmatprep.mubr.f32.mxu1 %v1720_v53 }
 0x33a   :  { %1880 = vmatmul.mubr.f32.gmra.mrb[84].mxu1 %v1719_v55  ;;  %v1721_v47 = vmax.f32 %v1671_v21, 0.0 }
 0x33b   :  { %v1722_v57 = vmax.f32 %v1673_v56, 0.0  ;;  %v1676_v16 = vpop.f32.mrb[56].mxu1 }
 0x33c   :  { %v1677_v46 = vadd.f32 %v1676_v16, %v3132_v26  ;;  %v1678_v49 = vpop.f32.mrb[57].mxu1 }
 0x33d   :  { %v1679_v58 = vadd.f32 %v1678_v49, %v3136_v52  ;;  %1884 = vmatprep.mubr.f32.mxu1 %v1722_v57 }
 0x33e   :  { %1885 = vmatmul.mubr.f32.gmra.mrb[86].mxu1 %v1721_v47  ;;  %v1723_v22 = vmax.f32 %v1677_v46, 0.0 }
 0x33f   :  { %v1724_v29 = vmax.f32 %v1679_v58, 0.0  ;;  %v1682_v59 = vpop.f32.mrb[58].mxu1 }
 0x340   :  { %v1683_v60 = vadd.f32 %v1682_v59, %v3132_v26  ;;  %v1684_v30 = vpop.f32.mrb[59].mxu1 }
 0x341   :  { %v1685_v61 = vadd.f32 %v1684_v30, %v3136_v52  ;;  %1889 = vmatprep.mubr.f32.mxu1 %v1724_v29 }
 0x342   :  { %1890 = vmatmul.mubr.f32.gmra.mrb[88].mxu1 %v1723_v22  ;;  %v1725_v31 = vmax.f32 %v1683_v60, 0.0 }
 0x343   :  { %v1726_v62 = vmax.f32 %v1685_v61, 0.0  ;;  %v1688_v63 = vpop.f32.mrb[60].mxu1 }
 0x344   :  { %v1689_v0 = vadd.f32 %v1688_v63, %v3132_v26  ;;  %v1690_v17 = vpop.f32.mrb[61].mxu1 }
 0x345   :  { %v1691_v1 = vadd.f32 %v1690_v17, %v3136_v52  ;;  %1894 = vmatprep.mubr.f32.mxu1 %v1726_v62 }
 0x346   :  { %1895 = vmatmul.mubr.f32.gmra.mrb[90].mxu1 %v1725_v31  ;;  %v1727_v2 = vmax.f32 %v1689_v0, 0.0 }
 0x347   :  { %v1728_v32 = vmax.f32 %v1691_v1, 0.0  ;;  %v1694_v23 = vpop.f32.mrb[62].mxu1 }
 0x348   :  { %v1695_v3 = vadd.f32 %v1694_v23, %v3132_v26  ;;  %v1696_v33 = vpop.f32.mrb[63].mxu1 }
 0x349   :  { %v1697_v4 = vadd.f32 %v1696_v33, %v3136_v52  ;;  %1899 = vmatprep.mubr.f32.mxu1 %v1728_v32 }
 0x34a   :  { %1900 = vmatmul.mubr.f32.gmra.mrb[92].mxu1 %v1727_v2  ;;  %v1729_v18 = vmax.f32 %v1695_v3, 0.0 }
 0x34b   :  { %v1730_v5 = vmax.f32 %v1697_v4, 0.0 }
 0x34d   :  { %1904 = vmatprep.mubr.f32.mxu1 %v1730_v5 }
 0x34e   :  { %1905 = vmatmul.mubr.f32.gmra.mrb[94].mxu1 %v1729_v18 }
 0x3e5   :  { %v2052_v37 = vpop.f32.mrb[64].mxu1 }
 0x3e6   :  { %v2053_v6 = vpop.f32.mrb[65].mxu1 }
 0x3e7   :  { %v2054_v7 = vadd.f32 %v2053_v6, %v2052_v37 }
 0x3e9   :  { %v1832_v38 = vadd.f32 %v2054_v7, %v1764_v24  ;;  %v2055_v8 = vpop.f32.mrb[66].mxu1 }
 0x3ea   :  { %v2056_v26 = vpop.f32.mrb[67].mxu1 }
 0x3eb   :  { %v1910_v9 = vmax.f32 %v1832_v38, 0.0  ;;  %v2057_v10 = vadd.f32 %v2056_v26, %v2055_v8 }
 0x3ed   :  { %1927 = vst.msk [vmem:[#allocation11] sm:$0xff] %vm1926_vm2, %v1910_v9  ;;  %v1837_v52 = vadd.f32 %v2057_v10, %v1764_v24  ;;  %v2058_v39 = vpop.f32.mrb[68].mxu1 }
 0x3ee   :  { %v2059_v11 = vpop.f32.mrb[69].mxu1 }
 0x3ef   :  { %v1911_v12 = vmax.f32 %v1837_v52, 0.0  ;;  %v2060_v25 = vadd.f32 %v2059_v11, %v2058_v39 }
 0x3f1   :  { %1928 = vst.msk [vmem:[#allocation11 + $0x8] sm:$0xff] %vm1926_vm2, %v1911_v12  ;;  %v1842_v40 = vadd.f32 %v2060_v25, %v1764_v24  ;;  %v2061_v19 = vpop.f32.mrb[70].mxu1 }
 0x3f2   :  { %v2062_v13 = vpop.f32.mrb[71].mxu1 }
 0x3f3   :  { %v1912_v14 = vmax.f32 %v1842_v40, 0.0  ;;  %v2063_v41 = vadd.f32 %v2062_v13, %v2061_v19 }
 0x3f4   :  { %v1980_v34 = vld [vmem:[#allocation11] sm:$0xff] }
 0x3f5   :  { %1981 = vst [vmem:[%s3200_s7] sm:$0xff] %v1980_v34  ;;  %1929 = vst.msk [vmem:[#allocation11 + $0x10] sm:$0xff] %vm1926_vm2, %v1912_v14  ;;  %v1847_v35 = vadd.f32 %v2063_v41, %v1764_v24  ;;  %v2064_v36 = vpop.f32.mrb[72].mxu1 }
 0x3f6   :  { %v2065_v42 = vpop.f32.mrb[73].mxu1 }
 0x3f7   :  { %v1913_v20 = vmax.f32 %v1847_v35, 0.0  ;;  %v2066_v45 = vadd.f32 %v2065_v42, %v2064_v36 }
 0x3f8   :  { %v1982_v48 = vld [vmem:[#allocation11 + $0x8] sm:$0xff] }
 0x3f9   :  { %1983 = vst [vmem:[%s3200_s7 + $0x8] sm:$0xff] %v1982_v48  ;;  %1930 = vst.msk [vmem:[#allocation11 + $0x18] sm:$0xff] %vm1926_vm2, %v1913_v20  ;;  %v1852_v43 = vadd.f32 %v2066_v45, %v1764_v24  ;;  %v2067_v44 = vpop.f32.mrb[74].mxu1 }
 0x3fa   :  { %v2068_v50 = vpop.f32.mrb[75].mxu1 }
 0x3fb   :  { %v1914_v51 = vmax.f32 %v1852_v43, 0.0 }
 0x3fc   :  { %v1984_v15 = vld [vmem:[#allocation11 + $0x10] sm:$0xff] }
 0x3fd   :  { %1985 = vst [vmem:[%s3200_s7 + $0x10] sm:$0xff] %v1984_v15  ;;  %1931 = vst.msk [vmem:[#allocation11 + $0x20] sm:$0xff] %vm1926_vm2, %v1914_v51  ;;  %v2070_v27 = vpop.f32.mrb[76].mxu1 }
 0x3fe   :  { %v2071_v53 = vpop.f32.mrb[77].mxu1 }
 0x400   :  { %v1986_v54 = vld [vmem:[#allocation11 + $0x18] sm:$0xff] }
 0x401   :  { %1987 = vst [vmem:[%s3200_s7 + $0x18] sm:$0xff] %v1986_v54  ;;  %v2073_v55 = vpop.f32.mrb[78].mxu1 }
 0x402   :  { %v2074_v21 = vpop.f32.mrb[79].mxu1 }
 0x404   :  { %v1988_v28 = vld [vmem:[#allocation11 + $0x20] sm:$0xff] }
 0x405   :  { %1989 = vst [vmem:[%s3200_s7 + $0x20] sm:$0xff] %v1988_v28  ;;  %v2076_v56 = vpop.f32.mrb[80].mxu1 }
 0x406   :  { %v2077_v57 = vpop.f32.mrb[81].mxu1 }
 0x409   :  { %v2079_v16 = vpop.f32.mrb[82].mxu1 }
 0x40a   :  { %v2080_v47 = vpop.f32.mrb[83].mxu1 }
 0x40d   :  { %v2082_v46 = vpop.f32.mrb[84].mxu1 }
 0x40e   :  { %v2083_v49 = vpop.f32.mrb[85].mxu1 }
 0x411   :  { %v2085_v58 = vpop.f32.mrb[86].mxu1 }
 0x412   :  { %v2086_v29 = vpop.f32.mrb[87].mxu1 }
 0x415   :  { %v2088_v59 = vpop.f32.mrb[88].mxu1 }
 0x416   :  { %v2089_v22 = vpop.f32.mrb[89].mxu1 }
 0x419   :  { %v2091_v60 = vpop.f32.mrb[90].mxu1 }
 0x41a   :  { %v2092_v30 = vpop.f32.mrb[91].mxu1 }
 0x41d   :  { %v2094_v61 = vpop.f32.mrb[92].mxu1 }
 0x41e   :  { %v2095_v62 = vpop.f32.mrb[93].mxu1 }
 0x421   :  { %v2097_v63 = vpop.f32.mrb[94].mxu1 }
 0x422   :  { %v2098_v31 = vpop.f32.mrb[95].mxu1 }
 0x423   :  { %1995 = vsyncpa [#allocation4], 1 }
 0x424   :  { %1996 = vsyncpa [#allocation6], 1 }
 0x425   :  { %1997 = vsyncpa [#allocation9], 1 }

</bundles_post_ra>
